<compile_context>
chip_gen: v6e
topology: v6e:2x2x1
jax: 0.10.0
libtpu: 0.0.40
codegen_flags: <defaults>
</compile_context>

<pallas_src>
import jax
import jax.numpy as jnp
from jax import lax
from jax.experimental import pallas as pl
from jax.experimental.pallas import tpu as pltpu

EPS = 1e-5  # nn.BatchNorm2d default


# ----------------------------- Pallas kernels ------------------------------

def _conv_rows_stats_kernel(xp_ref, wmat_ref, b_ref, g_ref,
                            y_ref, sum_ref, ssq_ref):
    """Fused 3x3 'same' conv (banded row-matmul form) + bias + BN statistics.

    xp_ref  : (1, H+2, (W+2)*Cin)   zero-padded input rows of one image
    wmat_ref: (3, (W+2)*Cin, W*Cout) banded weight matrix per vertical tap ky
    b_ref   : (1, W*Cout)            bias, lane-tiled over W
    g_ref   : (W*Cout, W*Cout)       G[l,m] = 1 iff l%Cout == m%Cout
    y_ref   : (H, W*Cout)            conv output rows (lane-dense)
    sum_ref, ssq_ref : (1, W*Cout)   per-channel sum / sum-of-squares,
                                     channel-combined and lane-tiled via G,
                                     accumulated across the batch grid axis.
    """
    @pl.when(pl.program_id(0) == 0)
    def _init():
        sum_ref[...] = jnp.zeros_like(sum_ref)
        ssq_ref[...] = jnp.zeros_like(ssq_ref)

    h = y_ref.shape[0]
    acc = jnp.dot(xp_ref[0, 0:h, :], wmat_ref[0],
                  preferred_element_type=jnp.float32)
    for ky in (1, 2):
        acc = acc + jnp.dot(xp_ref[0, ky:ky + h, :], wmat_ref[ky],
                            preferred_element_type=jnp.float32)
    y = acc + b_ref[...]
    y_ref[...] = y

    lane_sum = jnp.sum(y, axis=0, keepdims=True)        # (1, W*Cout)
    lane_ssq = jnp.sum(y * y, axis=0, keepdims=True)
    sum_ref[...] += jnp.dot(lane_sum, g_ref[...],
                            preferred_element_type=jnp.float32)
    ssq_ref[...] += jnp.dot(lane_ssq, g_ref[...],
                            preferred_element_type=jnp.float32)


def _bn_scale_shift(sums, ssqs, gamma, beta, inv_m):
    mean = sums * inv_m
    var = ssqs * inv_m - mean * mean          # biased variance (BN training)
    scale = gamma * lax.rsqrt(var + EPS)      # EUP rsqrt, in-kernel
    shift = beta - mean * scale
    return scale, shift


def _make_bn_relu_kernel(inv_m):
    def kernel(y_ref, sum_ref, ssq_ref, gamma_ref, beta_ref, o_ref):
        scale, shift = _bn_scale_shift(sum_ref[...], ssq_ref[...],
                                       gamma_ref[...], beta_ref[...], inv_m)
        o_ref[...] = jnp.maximum(y_ref[...] * scale + shift, 0.0)
    return kernel


def _make_bn_relu_vpool_kernel(inv_m):
    def kernel(y_ref, sum_ref, ssq_ref, gamma_ref, beta_ref, o_ref, vp_ref):
        scale, shift = _bn_scale_shift(sum_ref[...], ssq_ref[...],
                                       gamma_ref[...], beta_ref[...], inv_m)
        xo = jnp.maximum(y_ref[...] * scale[None] + shift[None], 0.0)
        o_ref[...] = xo                                   # (bp, 2, W*Cout)
        # vertical half of the 2x2 max-pool (rows 2i and 2i+1 of each pair)
        vp_ref[...] = jnp.maximum(xo[:, 0, :], xo[:, 1, :])
    return kernel


# ------------------------------ pallas wrappers ------------------------------

def _conv3x3_bias_stats(xp_rows, wmat, bias_t, gmat):
    """xp_rows: (N, H+2, (W+2)*Cin) -> y (N*H, W*Cout), sums, ssqs (1, W*Cout)."""
    n, hp2, pc = xp_rows.shape
    h = hp2 - 2
    wc = wmat.shape[-1]
    return pl.pallas_call(
        _conv_rows_stats_kernel,
        out_shape=(
            jax.ShapeDtypeStruct((n * h, wc), jnp.float32),
            jax.ShapeDtypeStruct((1, wc), jnp.float32),
            jax.ShapeDtypeStruct((1, wc), jnp.float32),
        ),
        grid=(n,),
        in_specs=[
            pl.BlockSpec((1, hp2, pc), lambda i: (i, 0, 0)),
            pl.BlockSpec((3, pc, wc), lambda i: (0, 0, 0)),
            pl.BlockSpec((1, wc), lambda i: (0, 0)),
            pl.BlockSpec((wc, wc), lambda i: (0, 0)),
        ],
        out_specs=(
            pl.BlockSpec((h, wc), lambda i: (i, 0)),
            pl.BlockSpec((1, wc), lambda i: (0, 0)),
            pl.BlockSpec((1, wc), lambda i: (0, 0)),
        ),
        compiler_params=pltpu.CompilerParams(
            dimension_semantics=("arbitrary",)),  # stats accumulate across batch
    )(xp_rows, wmat, bias_t, gmat)


def _bn_relu(y_dense, sums, ssqs, gamma_t, beta_t, inv_m, block_rows):
    m, wc = y_dense.shape
    assert m % block_rows == 0 and block_rows % 8 == 0
    aux = pl.BlockSpec((1, wc), lambda i: (0, 0))
    return pl.pallas_call(
        _make_bn_relu_kernel(inv_m),
        out_shape=jax.ShapeDtypeStruct((m, wc), jnp.float32),
        grid=(m // block_rows,),
        in_specs=[pl.BlockSpec((block_rows, wc), lambda i: (i, 0)),
                  aux, aux, aux, aux],
        out_specs=pl.BlockSpec((block_rows, wc), lambda i: (i, 0)),
        compiler_params=pltpu.CompilerParams(
            dimension_semantics=("parallel",)),
    )(y_dense, sums, ssqs, gamma_t, beta_t)


def _bn_relu_vpool(y_dense, sums, ssqs, gamma_t, beta_t, inv_m, block_pairs):
    m, wc = y_dense.shape          # m = N*H
    rp = m // 2                    # number of vertical row pairs
    assert rp % block_pairairs == 0 if False else rp % block_pairs == 0
    y3 = y_dense.reshape(rp, 2, wc)          # free reshape (pairs, 2, W*C)
    aux = pl.BlockSpec((1, wc), lambda i: (0, 0))
    xo, vp = pl.pallas_call(
        _make_bn_relu_vpool_kernel(inv_m),
        out_shape=(jax.ShapeDtypeStruct((rp, 2, wc), jnp.float32),
                   jax.ShapeDtypeStruct((rp, wc), jnp.float32)),
        grid=(rp // block_pairs,),
        in_specs=[pl.BlockSpec((block_pairs, 2, wc), lambda i: (i, 0, 0)),
                  aux, aux, aux, aux],
        out_specs=(pl.BlockSpec((block_pairs, 2, wc), lambda i: (i, 0, 0)),
                   pl.BlockSpec((block_pairs, wc), lambda i: (i, 0))),
        compiler_params=pltpu.CompilerParams(
            dimension_semantics=("parallel",)),
    )(y3, sums, ssqs, gamma_t, beta_t)
    return xo.reshape(m, wc), vp


# ------------------------------- host glue -----------------------------------

def _build_row_conv_mats(wt, w_out):
    """wt: (3, 3, Cin, Cout) HWIO -> (3, (W+2)*Cin, W*Cout) banded matrices."""
    k, _, cin, cout = wt.shape
    p = w_out + 2
    sel = (jnp.arange(p)[None, :, None] ==
           (jnp.arange(w_out)[None, None, :] + jnp.arange(k)[:, None, None]))
    sel = sel.astype(wt.dtype)                           # (3, W+2, W)
    m = jnp.einsum("kpw,ykio->ypiwo", sel, wt)           # (3, W+2, Cin, W, Cout)
    return m.reshape(k, p * cin, w_out * cout)


def _pad_rows(x_nhwc):
    n, h, w, c = x_nhwc.shape
    xp = jnp.pad(x_nhwc, ((0, 0), (1, 1), (1, 1), (0, 0)))
    return xp.reshape(n, h + 2, (w + 2) * c)             # (N, H+2, (W+2)*C)


def encoder_forward(x_nchw, params):
    """Pallas implementation of Encoder.forward (returns (x, p), both NCHW)."""
    w1, b1, g1, be1, w2, b2, g2, be2 = params            # w: (3,3,Cin,Cout) HWIO
    x = jnp.transpose(x_nchw, (0, 2, 3, 1)).astype(jnp.float32)   # NHWC
    n, h, w, cin = x.shape
    cout = w1.shape[-1]
    wc = w * cout
    inv_m = 1.0 / float(n * h * w)

    # Parameter preprocessing (done once, independent of activations).
    wmat1 = _build_row_conv_mats(w1.astype(jnp.float32), w)
    wmat2 = _build_row_conv_mats(w2.astype(jnp.float32), w)
    b1_t = jnp.tile(b1, w).reshape(1, wc)
    b2_t = jnp.tile(b2, w).reshape(1, wc)
    g1_t = jnp.tile(g1, w).reshape(1, wc)
    g2_t = jnp.tile(g2, w).reshape(1, wc)
    be1_t = jnp.tile(be1, w).reshape(1, wc)
    be2_t = jnp.tile(be2, w).reshape(1, wc)
    lane = jnp.arange(wc)
    gmat = (lane[:, None] % cout == lane[None, :] % cout).astype(jnp.float32)

    # ---- layer 1: fused conv+bias+stats, then fused BN(+rsqrt)+ReLU ----
    y1, s1, q1 = _conv3x3_bias_stats(_pad_rows(x), wmat1, b1_t, gmat)
    h1 = _bn_relu(y1, s1, q1, g1_t, be1_t, inv_m, block_rows=(n * h) // 2)

    # ---- layer 2: fused conv+bias+stats, then BN+ReLU + vertical max-pool ----
    y2, s2, q2 = _conv3x3_bias_stats(_pad_rows(h1.reshape(n, h, w, cout)),
                                     wmat2, b2_t, gmat)
    xo_dense, vpool = _bn_relu_vpool(y2, s2, q2, g2_t, be2_t, inv_m,
                                     block_pairs=(n * h) // 4)

    xo = xo_dense.reshape(n, h, w, cout)
    # TODO(synk): the horizontal half of the 2x2 max-pool stays a tiny XLA op
    # (2-slice max over an 8 KB buffer); doing it in-kernel at C=8 would need a
    # lane shuffle (pltpu.roll) for questionable gain at this size.
    vp = vpool.reshape(n, h // 2, w // 2, 2, cout)
    p = jnp.maximum(vp[..., 0, :], vp[..., 1, :])

    return jnp.transpose(xo, (0, 3, 1, 2)), jnp.transpose(p, (0, 3, 1, 2))


# ---------------------------- pure-JAX reference ----------------------------

def reference_forward(x_nchw, params):
    w1, b1, g1, be1, w2, b2, g2, be2 = params
    x = jnp.transpose(x_nchw, (0, 2, 3, 1)).astype(jnp.float32)

    def conv(x, w, b):
        y = lax.conv_general_dilated(
            x, w, (1, 1), "SAME",
            dimension_numbers=("NHWC", "HWIO", "NHWC"),
            precision=lax.Precision.HIGHEST,
        )
        return y + b

    def bn_relu_ref(y, g, be):
        mean = jnp.mean(y, axis=(0, 1, 2))
        var = jnp.mean((y - mean) ** 2, axis=(0, 1, 2))  # biased (training BN)
        return jnp.maximum((y - mean) / jnp.sqrt(var + EPS) * g + be, 0.0)

    hh = bn_relu_ref(conv(x, w1, b1), g1, be1)
    xo = bn_relu_ref(conv(hh, w2, b2), g2, be2)
    p = lax.reduce_window(xo, -jnp.inf, lax.max, (1, 2, 2, 1), (1, 2, 2, 1), "VALID")
    return jnp.transpose(xo, (0, 3, 1, 2)), jnp.transpose(p, (0, 3, 1, 2))


# --------------------------------- main --------------------------------------

if __name__ == "__main__":
    N, Cin, Cout, H, W = 2, 4, 8, 16, 16

    key = jax.random.PRNGKey(0)
    ks = jax.random.split(key, 9)
    x = jax.random.normal(ks[0], (N, Cin, H, W), jnp.float32)            # NCHW
    w1 = jax.random.normal(ks[1], (3, 3, Cin, Cout), jnp.float32) * 0.1  # HWIO
    b1 = jax.random.normal(ks[2], (Cout,), jnp.float32) * 0.1
    g1 = 1.0 + jax.random.normal(ks[3], (Cout,), jnp.float32) * 0.1
    be1 = jax.random.normal(ks[4], (Cout,), jnp.float32) * 0.1
    w2 = jax.random.normal(ks[5], (3, 3, Cout, Cout), jnp.float32) * 0.1
    b2 = jax.random.normal(ks[6], (Cout,), jnp.float32) * 0.1
    g2 = 1.0 + jax.random.normal(ks[7], (Cout,), jnp.float32) * 0.1
    be2 = jax.random.normal(ks[8], (Cout,), jnp.float32) * 0.1
    params = (w1, b1, g1, be1, w2, b2, g2, be2)

    fwd = jax.jit(encoder_forward)
    x_out, p_out = fwd(x, params)
    x_out = jax.block_until_ready(x_out)
    p_out = jax.block_until_ready(p_out)

    x_ref, p_ref = reference_forward(x, params)
    assert x_out.shape == (N, Cout, H, W)
    assert p_out.shape == (N, Cout, H // 2, W // 2)
    assert jnp.allclose(x_out, x_ref, atol=1e-3, rtol=1e-3)
    assert jnp.allclose(p_out, p_ref, atol=1e-3, rtol=1e-3)

    print("KERNEL_OK")
</pallas_src>

<mosaic_0001>
module attributes {stable_mosaic.version = 11 : i64} {
  func.func @_conv_rows_stats_kernel(%arg0: i32, %arg1: memref<1x18x72xf32, #tpu.memory_space<vmem>>, %arg2: memref<3x72x128xf32, #tpu.memory_space<vmem>>, %arg3: memref<1x128xf32, #tpu.memory_space<vmem>>, %arg4: memref<128x128xf32, #tpu.memory_space<vmem>>, %arg5: memref<16x128xf32, #tpu.memory_space<vmem>>, %arg6: memref<1x128xf32, #tpu.memory_space<vmem>>, %arg7: memref<1x128xf32, #tpu.memory_space<vmem>>) attributes {dimension_semantics = [#tpu.dimension_semantics<arbitrary>], iteration_bounds = array<i64: 2>, scalar_prefetch = 0 : i64, scratch_operands = 0 : i64, tpu.core_type = #tpu.core_type<tc>, window_params = [{transform_indices = @transform_0, window_bounds = array<i64: 1, 18, 72>}, {pipeline_mode = #tpu.pipeline_mode<synchronous>, transform_indices = @transform_1, window_bounds = array<i64: 3, 72, 128>}, {pipeline_mode = #tpu.pipeline_mode<synchronous>, transform_indices = @transform_2, window_bounds = array<i64: 1, 128>}, {pipeline_mode = #tpu.pipeline_mode<synchronous>, transform_indices = @transform_3, window_bounds = array<i64: 128, 128>}, {transform_indices = @transform_4, window_bounds = array<i64: 16, 128>}, {pipeline_mode = #tpu.pipeline_mode<synchronous>, transform_indices = @transform_5, window_bounds = array<i64: 1, 128>}, {pipeline_mode = #tpu.pipeline_mode<synchronous>, transform_indices = @transform_6, window_bounds = array<i64: 1, 128>}]} {
    %c0_i32 = arith.constant 0 : i32
    %0 = arith.cmpi eq, %arg0, %c0_i32 : i32
    %1 = arith.extui %0 : i1 to i32
    %c0_i32_0 = arith.constant 0 : i32
    %2 = arith.cmpi ne, %1, %c0_i32_0 : i32
    scf.if %2 {
      %cst_38 = arith.constant 0.000000e+00 : f32
      %39 = vector.broadcast %cst_38 : f32 to vector<1x128xf32>
      %c0_39 = arith.constant 0 : index
      %c0_40 = arith.constant 0 : index
      %40 = vector.load %arg6[%c0_39, %c0_40] : memref<1x128xf32, #tpu.memory_space<vmem>>, vector<1x128xf32>
      tpu.vector_store %arg6[%c0_39, %c0_40], %39 {strides = array<i32>} : memref<1x128xf32, #tpu.memory_space<vmem>>, vector<1x128xf32>,
      %cst_41 = arith.constant 0.000000e+00 : f32
      %41 = vector.broadcast %cst_41 : f32 to vector<1x128xf32>
      %c0_42 = arith.constant 0 : index
      %c0_43 = arith.constant 0 : index
      %42 = vector.load %arg7[%c0_42, %c0_43] : memref<1x128xf32, #tpu.memory_space<vmem>>, vector<1x128xf32>
      tpu.vector_store %arg7[%c0_42, %c0_43], %41 {strides = array<i32>} : memref<1x128xf32, #tpu.memory_space<vmem>>, vector<1x128xf32>,
    } else {
    }
    %c0 = arith.constant 0 : index
    %c0_1 = arith.constant 0 : index
    %c0_2 = arith.constant 0 : index
    %3 = vector.load %arg1[%c0, %c0_1, %c0_2] : memref<1x18x72xf32, #tpu.memory_space<vmem>>, vector<1x16x72xf32>
    %4 = vector.shape_cast %3 : vector<1x16x72xf32> to vector<16x72xf32>
    %c0_3 = arith.constant 0 : index
    %c0_4 = arith.constant 0 : index
    %c0_5 = arith.constant 0 : index
    %5 = vector.load %arg2[%c0_3, %c0_4, %c0_5] : memref<3x72x128xf32, #tpu.memory_space<vmem>>, vector<1x72x128xf32>
    %6 = vector.shape_cast %5 : vector<1x72x128xf32> to vector<72x128xf32>
    %cst = arith.constant dense<0.000000e+00> : vector<16x128xf32>
    %7 = tpu.matmul %4, %6, %cst {dimension_numbers = #tpu.dot_dimension_numbers<[1], [0], [0], [1], [0, 0, 1, 1], [], []>} : vector<16x72xf32>, vector<72x128xf32>, vector<16x128xf32> -> vector<16x128xf32>
    %c0_6 = arith.constant 0 : index
    %c1 = arith.constant 1 : index
    %c0_7 = arith.constant 0 : index
    %8 = vector.load %arg1[%c0_6, %c1, %c0_7] : memref<1x18x72xf32, #tpu.memory_space<vmem>>, vector<1x16x72xf32>
    %9 = vector.shape_cast %8 : vector<1x16x72xf32> to vector<16x72xf32>
    %c1_8 = arith.constant 1 : index
    %c0_9 = arith.constant 0 : index
    %c0_10 = arith.constant 0 : index
    %10 = vector.load %arg2[%c1_8, %c0_9, %c0_10] : memref<3x72x128xf32, #tpu.memory_space<vmem>>, vector<1x72x128xf32>
    %11 = vector.shape_cast %10 : vector<1x72x128xf32> to vector<72x128xf32>
    %cst_11 = arith.constant dense<0.000000e+00> : vector<16x128xf32>
    %12 = tpu.matmul %9, %11, %cst_11 {dimension_numbers = #tpu.dot_dimension_numbers<[1], [0], [0], [1], [0, 0, 1, 1], [], []>} : vector<16x72xf32>, vector<72x128xf32>, vector<16x128xf32> -> vector<16x128xf32>
    %13 = arith.addf %7, %12 : vector<16x128xf32>
    %c0_12 = arith.constant 0 : index
    %c2 = arith.constant 2 : index
    %c0_13 = arith.constant 0 : index
    %14 = vector.load %arg1[%c0_12, %c2, %c0_13] : memref<1x18x72xf32, #tpu.memory_space<vmem>>, vector<1x16x72xf32>
    %15 = vector.shape_cast %14 : vector<1x16x72xf32> to vector<16x72xf32>
    %c2_14 = arith.constant 2 : index
    %c0_15 = arith.constant 0 : index
    %c0_16 = arith.constant 0 : index
    %16 = vector.load %arg2[%c2_14, %c0_15, %c0_16] : memref<3x72x128xf32, #tpu.memory_space<vmem>>, vector<1x72x128xf32>
    %17 = vector.shape_cast %16 : vector<1x72x128xf32> to vector<72x128xf32>
    %cst_17 = arith.constant dense<0.000000e+00> : vector<16x128xf32>
    %18 = tpu.matmul %15, %17, %cst_17 {dimension_numbers = #tpu.dot_dimension_numbers<[1], [0], [0], [1], [0, 0, 1, 1], [], []>} : vector<16x72xf32>, vector<72x128xf32>, vector<16x128xf32> -> vector<16x128xf32>
    %19 = arith.addf %13, %18 : vector<16x128xf32>
    %c0_18 = arith.constant 0 : index
    %c0_19 = arith.constant 0 : index
    %20 = vector.load %arg3[%c0_18, %c0_19] : memref<1x128xf32, #tpu.memory_space<vmem>>, vector<1x128xf32>
    %21 = vector.broadcast %20 : vector<1x128xf32> to vector<16x128xf32>
    %22 = arith.addf %19, %21 : vector<16x128xf32>
    %c0_20 = arith.constant 0 : index
    %c0_21 = arith.constant 0 : index
    %23 = vector.load %arg5[%c0_20, %c0_21] : memref<16x128xf32, #tpu.memory_space<vmem>>, vector<16x128xf32>
    tpu.vector_store %arg5[%c0_20, %c0_21], %22 {strides = array<i32>} : memref<16x128xf32, #tpu.memory_space<vmem>>, vector<16x128xf32>,
    %cst_22 = arith.constant dense<0.000000e+00> : vector<128xf32>
    %24 = vector.multi_reduction <add>, %22, %cst_22 [0] : vector<16x128xf32> to vector<128xf32>
    %25 = vector.shape_cast %24 : vector<128xf32> to vector<1x128xf32>
    %26 = arith.mulf %22, %22 : vector<16x128xf32>
    %cst_23 = arith.constant dense<0.000000e+00> : vector<128xf32>
    %27 = vector.multi_reduction <add>, %26, %cst_23 [0] : vector<16x128xf32> to vector<128xf32>
    %28 = vector.shape_cast %27 : vector<128xf32> to vector<1x128xf32>
    %c0_24 = arith.constant 0 : index
    %c0_25 = arith.constant 0 : index
    %29 = vector.load %arg6[%c0_24, %c0_25] : memref<1x128xf32, #tpu.memory_space<vmem>>, vector<1x128xf32>
    %c0_26 = arith.constant 0 : index
    %c0_27 = arith.constant 0 : index
    %30 = vector.load %arg4[%c0_26, %c0_27] : memref<128x128xf32, #tpu.memory_space<vmem>>, vector<128x128xf32>
    %cst_28 = arith.constant dense<0.000000e+00> : vector<1x128xf32>
    %31 = tpu.matmul %25, %30, %cst_28 {dimension_numbers = #tpu.dot_dimension_numbers<[1], [0], [0], [1], [0, 0, 1, 1], [], []>} : vector<1x128xf32>, vector<128x128xf32>, vector<1x128xf32> -> vector<1x128xf32>
    %32 = arith.addf %29, %31 : vector<1x128xf32>
    %c0_29 = arith.constant 0 : index
    %c0_30 = arith.constant 0 : index
    %33 = vector.load %arg6[%c0_29, %c0_30] : memref<1x128xf32, #tpu.memory_space<vmem>>, vector<1x128xf32>
    tpu.vector_store %arg6[%c0_29, %c0_30], %32 {strides = array<i32>} : memref<1x128xf32, #tpu.memory_space<vmem>>, vector<1x128xf32>,
    %c0_31 = arith.constant 0 : index
    %c0_32 = arith.constant 0 : index
    %34 = vector.load %arg7[%c0_31, %c0_32] : memref<1x128xf32, #tpu.memory_space<vmem>>, vector<1x128xf32>
    %c0_33 = arith.constant 0 : index
    %c0_34 = arith.constant 0 : index
    %35 = vector.load %arg4[%c0_33, %c0_34] : memref<128x128xf32, #tpu.memory_space<vmem>>, vector<128x128xf32>
    %cst_35 = arith.constant dense<0.000000e+00> : vector<1x128xf32>
    %36 = tpu.matmul %28, %35, %cst_35 {dimension_numbers = #tpu.dot_dimension_numbers<[1], [0], [0], [1], [0, 0, 1, 1], [], []>} : vector<1x128xf32>, vector<128x128xf32>, vector<1x128xf32> -> vector<1x128xf32>
    %37 = arith.addf %34, %36 : vector<1x128xf32>
    %c0_36 = arith.constant 0 : index
    %c0_37 = arith.constant 0 : index
    %38 = vector.load %arg7[%c0_36, %c0_37] : memref<1x128xf32, #tpu.memory_space<vmem>>, vector<1x128xf32>
    tpu.vector_store %arg7[%c0_36, %c0_37], %37 {strides = array<i32>} : memref<1x128xf32, #tpu.memory_space<vmem>>, vector<1x128xf32>,
    return
  }
  func.func @transform_0(%arg0: i32) -> (i32, i32, i32) {
    %c0_i32 = arith.constant 0 : i32
    %c0_i32_0 = arith.constant 0 : i32
    %c0_i32_1 = arith.constant 0 : i32
    return %arg0, %c0_i32, %c0_i32_0 : i32, i32, i32
  }
  func.func @transform_1(%arg0: i32) -> (i32, i32, i32) {
    %c0_i32 = arith.constant 0 : i32
    %c0_i32_0 = arith.constant 0 : i32
    %c0_i32_1 = arith.constant 0 : i32
    %c0_i32_2 = arith.constant 0 : i32
    return %c0_i32, %c0_i32_0, %c0_i32_1 : i32, i32, i32
  }
  func.func @transform_2(%arg0: i32) -> (i32, i32) {
    %c0_i32 = arith.constant 0 : i32
    %c0_i32_0 = arith.constant 0 : i32
    %c0_i32_1 = arith.constant 0 : i32
    return %c0_i32, %c0_i32_0 : i32, i32
  }
  func.func @transform_3(%arg0: i32) -> (i32, i32) {
    %c0_i32 = arith.constant 0 : i32
    %c0_i32_0 = arith.constant 0 : i32
    %c0_i32_1 = arith.constant 0 : i32
    return %c0_i32, %c0_i32_0 : i32, i32
  }
  func.func @transform_4(%arg0: i32) -> (i32, i32) {
    %c0_i32 = arith.constant 0 : i32
    %c0_i32_0 = arith.constant 0 : i32
    return %arg0, %c0_i32 : i32, i32
  }
  func.func @transform_5(%arg0: i32) -> (i32, i32) {
    %c0_i32 = arith.constant 0 : i32
    %c0_i32_0 = arith.constant 0 : i32
    %c0_i32_1 = arith.constant 0 : i32
    return %c0_i32, %c0_i32_0 : i32, i32
  }
  func.func @transform_6(%arg0: i32) -> (i32, i32) {
    %c0_i32 = arith.constant 0 : i32
    %c0_i32_0 = arith.constant 0 : i32
    %c0_i32_1 = arith.constant 0 : i32
    return %c0_i32, %c0_i32_0 : i32, i32
  }
}

module attributes {stable_mosaic.version = 11 : i64} {
  func.func @kernel(%arg0: i32, %arg1: memref<16x128xf32, #tpu.memory_space<vmem>>, %arg2: memref<1x128xf32, #tpu.memory_space<vmem>>, %arg3: memref<1x128xf32, #tpu.memory_space<vmem>>, %arg4: memref<1x128xf32, #tpu.memory_space<vmem>>, %arg5: memref<1x128xf32, #tpu.memory_space<vmem>>, %arg6: memref<16x128xf32, #tpu.memory_space<vmem>>) attributes {dimension_semantics = [#tpu.dimension_semantics<parallel>], iteration_bounds = array<i64: 2>, scalar_prefetch = 0 : i64, scratch_operands = 0 : i64, tpu.core_type = #tpu.core_type<tc>, window_params = [{transform_indices = @transform_0, window_bounds = array<i64: 16, 128>}, {pipeline_mode = #tpu.pipeline_mode<synchronous>, transform_indices = @transform_1, window_bounds = array<i64: 1, 128>}, {pipeline_mode = #tpu.pipeline_mode<synchronous>, transform_indices = @transform_2, window_bounds = array<i64: 1, 128>}, {pipeline_mode = #tpu.pipeline_mode<synchronous>, transform_indices = @transform_3, window_bounds = array<i64: 1, 128>}, {pipeline_mode = #tpu.pipeline_mode<synchronous>, transform_indices = @transform_4, window_bounds = array<i64: 1, 128>}, {transform_indices = @transform_5, window_bounds = array<i64: 16, 128>}]} {
    %c0 = arith.constant 0 : index
    %c0_0 = arith.constant 0 : index
    %0 = vector.load %arg2[%c0, %c0_0] : memref<1x128xf32, #tpu.memory_space<vmem>>, vector<1x128xf32>
    %c0_1 = arith.constant 0 : index
    %c0_2 = arith.constant 0 : index
    %1 = vector.load %arg3[%c0_1, %c0_2] : memref<1x128xf32, #tpu.memory_space<vmem>>, vector<1x128xf32>
    %c0_3 = arith.constant 0 : index
    %c0_4 = arith.constant 0 : index
    %2 = vector.load %arg4[%c0_3, %c0_4] : memref<1x128xf32, #tpu.memory_space<vmem>>, vector<1x128xf32>
    %c0_5 = arith.constant 0 : index
    %c0_6 = arith.constant 0 : index
    %3 = vector.load %arg5[%c0_5, %c0_6] : memref<1x128xf32, #tpu.memory_space<vmem>>, vector<1x128xf32>
    %cst = arith.constant 0.001953125 : f32
    %4 = vector.broadcast %cst : f32 to vector<1x128xf32>
    %5 = arith.mulf %0, %4 : vector<1x128xf32>
    %cst_7 = arith.constant 0.001953125 : f32
    %6 = vector.broadcast %cst_7 : f32 to vector<1x128xf32>
    %7 = arith.mulf %1, %6 : vector<1x128xf32>
    %8 = arith.mulf %5, %5 : vector<1x128xf32>
    %9 = arith.subf %7, %8 : vector<1x128xf32>
    %cst_8 = arith.constant 9.99999974E-6 : f32
    %10 = vector.broadcast %cst_8 : f32 to vector<1x128xf32>
    %11 = arith.addf %9, %10 : vector<1x128xf32>
    %12 = math.rsqrt %11 : vector<1x128xf32>
    %13 = arith.mulf %2, %12 : vector<1x128xf32>
    %14 = arith.mulf %5, %13 : vector<1x128xf32>
    %15 = arith.subf %3, %14 : vector<1x128xf32>
    %c0_9 = arith.constant 0 : index
    %c0_10 = arith.constant 0 : index
    %16 = vector.load %arg1[%c0_9, %c0_10] : memref<16x128xf32, #tpu.memory_space<vmem>>, vector<16x128xf32>
    %17 = vector.broadcast %13 : vector<1x128xf32> to vector<16x128xf32>
    %18 = arith.mulf %16, %17 : vector<16x128xf32>
    %19 = vector.broadcast %15 : vector<1x128xf32> to vector<16x128xf32>
    %20 = arith.addf %18, %19 : vector<16x128xf32>
    %cst_11 = arith.constant 0.000000e+00 : f32
    %21 = vector.broadcast %cst_11 : f32 to vector<16x128xf32>
    %22 = arith.maximumf %20, %21 : vector<16x128xf32>
    %c0_12 = arith.constant 0 : index
    %c0_13 = arith.constant 0 : index
    %23 = vector.load %arg6[%c0_12, %c0_13] : memref<16x128xf32, #tpu.memory_space<vmem>>, vector<16x128xf32>
    tpu.vector_store %arg6[%c0_12, %c0_13], %22 {strides = array<i32>} : memref<16x128xf32, #tpu.memory_space<vmem>>, vector<16x128xf32>,
    return
  }
  func.func @transform_0(%arg0: i32) -> (i32, i32) {
    %c0_i32 = arith.constant 0 : i32
    %c0_i32_0 = arith.constant 0 : i32
    return %arg0, %c0_i32 : i32, i32
  }
  func.func @transform_1(%arg0: i32) -> (i32, i32) {
    %c0_i32 = arith.constant 0 : i32
    %c0_i32_0 = arith.constant 0 : i32
    %c0_i32_1 = arith.constant 0 : i32
    return %c0_i32, %c0_i32_0 : i32, i32
  }
  func.func @transform_2(%arg0: i32) -> (i32, i32) {
    %c0_i32 = arith.constant 0 : i32
    %c0_i32_0 = arith.constant 0 : i32
    %c0_i32_1 = arith.constant 0 : i32
    return %c0_i32, %c0_i32_0 : i32, i32
  }
  func.func @transform_3(%arg0: i32) -> (i32, i32) {
    %c0_i32 = arith.constant 0 : i32
    %c0_i32_0 = arith.constant 0 : i32
    %c0_i32_1 = arith.constant 0 : i32
    return %c0_i32, %c0_i32_0 : i32, i32
  }
  func.func @transform_4(%arg0: i32) -> (i32, i32) {
    %c0_i32 = arith.constant 0 : i32
    %c0_i32_0 = arith.constant 0 : i32
    %c0_i32_1 = arith.constant 0 : i32
    return %c0_i32, %c0_i32_0 : i32, i32
  }
  func.func @transform_5(%arg0: i32) -> (i32, i32) {
    %c0_i32 = arith.constant 0 : i32
    %c0_i32_0 = arith.constant 0 : i32
    return %arg0, %c0_i32 : i32, i32
  }
}

module attributes {stable_mosaic.version = 11 : i64} {
  func.func @_conv_rows_stats_kernel(%arg0: i32, %arg1: memref<1x18x144xf32, #tpu.memory_space<vmem>>, %arg2: memref<3x144x128xf32, #tpu.memory_space<vmem>>, %arg3: memref<1x128xf32, #tpu.memory_space<vmem>>, %arg4: memref<128x128xf32, #tpu.memory_space<vmem>>, %arg5: memref<16x128xf32, #tpu.memory_space<vmem>>, %arg6: memref<1x128xf32, #tpu.memory_space<vmem>>, %arg7: memref<1x128xf32, #tpu.memory_space<vmem>>) attributes {dimension_semantics = [#tpu.dimension_semantics<arbitrary>], iteration_bounds = array<i64: 2>, scalar_prefetch = 0 : i64, scratch_operands = 0 : i64, tpu.core_type = #tpu.core_type<tc>, window_params = [{transform_indices = @transform_0, window_bounds = array<i64: 1, 18, 144>}, {pipeline_mode = #tpu.pipeline_mode<synchronous>, transform_indices = @transform_1, window_bounds = array<i64: 3, 144, 128>}, {pipeline_mode = #tpu.pipeline_mode<synchronous>, transform_indices = @transform_2, window_bounds = array<i64: 1, 128>}, {pipeline_mode = #tpu.pipeline_mode<synchronous>, transform_indices = @transform_3, window_bounds = array<i64: 128, 128>}, {transform_indices = @transform_4, window_bounds = array<i64: 16, 128>}, {pipeline_mode = #tpu.pipeline_mode<synchronous>, transform_indices = @transform_5, window_bounds = array<i64: 1, 128>}, {pipeline_mode = #tpu.pipeline_mode<synchronous>, transform_indices = @transform_6, window_bounds = array<i64: 1, 128>}]} {
    %c0_i32 = arith.constant 0 : i32
    %0 = arith.cmpi eq, %arg0, %c0_i32 : i32
    %1 = arith.extui %0 : i1 to i32
    %c0_i32_0 = arith.constant 0 : i32
    %2 = arith.cmpi ne, %1, %c0_i32_0 : i32
    scf.if %2 {
      %cst_38 = arith.constant 0.000000e+00 : f32
      %39 = vector.broadcast %cst_38 : f32 to vector<1x128xf32>
      %c0_39 = arith.constant 0 : index
      %c0_40 = arith.constant 0 : index
      %40 = vector.load %arg6[%c0_39, %c0_40] : memref<1x128xf32, #tpu.memory_space<vmem>>, vector<1x128xf32>
      tpu.vector_store %arg6[%c0_39, %c0_40], %39 {strides = array<i32>} : memref<1x128xf32, #tpu.memory_space<vmem>>, vector<1x128xf32>,
      %cst_41 = arith.constant 0.000000e+00 : f32
      %41 = vector.broadcast %cst_41 : f32 to vector<1x128xf32>
      %c0_42 = arith.constant 0 : index
      %c0_43 = arith.constant 0 : index
      %42 = vector.load %arg7[%c0_42, %c0_43] : memref<1x128xf32, #tpu.memory_space<vmem>>, vector<1x128xf32>
      tpu.vector_store %arg7[%c0_42, %c0_43], %41 {strides = array<i32>} : memref<1x128xf32, #tpu.memory_space<vmem>>, vector<1x128xf32>,
    } else {
    }
    %c0 = arith.constant 0 : index
    %c0_1 = arith.constant 0 : index
    %c0_2 = arith.constant 0 : index
    %3 = vector.load %arg1[%c0, %c0_1, %c0_2] : memref<1x18x144xf32, #tpu.memory_space<vmem>>, vector<1x16x144xf32>
    %4 = vector.shape_cast %3 : vector<1x16x144xf32> to vector<16x144xf32>
    %c0_3 = arith.constant 0 : index
    %c0_4 = arith.constant 0 : index
    %c0_5 = arith.constant 0 : index
    %5 = vector.load %arg2[%c0_3, %c0_4, %c0_5] : memref<3x144x128xf32, #tpu.memory_space<vmem>>, vector<1x144x128xf32>
    %6 = vector.shape_cast %5 : vector<1x144x128xf32> to vector<144x128xf32>
    %cst = arith.constant dense<0.000000e+00> : vector<16x128xf32>
    %7 = tpu.matmul %4, %6, %cst {dimension_numbers = #tpu.dot_dimension_numbers<[1], [0], [0], [1], [0, 0, 1, 1], [], []>} : vector<16x144xf32>, vector<144x128xf32>, vector<16x128xf32> -> vector<16x128xf32>
    %c0_6 = arith.constant 0 : index
    %c1 = arith.constant 1 : index
    %c0_7 = arith.constant 0 : index
    %8 = vector.load %arg1[%c0_6, %c1, %c0_7] : memref<1x18x144xf32, #tpu.memory_space<vmem>>, vector<1x16x144xf32>
    %9 = vector.shape_cast %8 : vector<1x16x144xf32> to vector<16x144xf32>
    %c1_8 = arith.constant 1 : index
    %c0_9 = arith.constant 0 : index
    %c0_10 = arith.constant 0 : index
    %10 = vector.load %arg2[%c1_8, %c0_9, %c0_10] : memref<3x144x128xf32, #tpu.memory_space<vmem>>, vector<1x144x128xf32>
    %11 = vector.shape_cast %10 : vector<1x144x128xf32> to vector<144x128xf32>
    %cst_11 = arith.constant dense<0.000000e+00> : vector<16x128xf32>
    %12 = tpu.matmul %9, %11, %cst_11 {dimension_numbers = #tpu.dot_dimension_numbers<[1], [0], [0], [1], [0, 0, 1, 1], [], []>} : vector<16x144xf32>, vector<144x128xf32>, vector<16x128xf32> -> vector<16x128xf32>
    %13 = arith.addf %7, %12 : vector<16x128xf32>
    %c0_12 = arith.constant 0 : index
    %c2 = arith.constant 2 : index
    %c0_13 = arith.constant 0 : index
    %14 = vector.load %arg1[%c0_12, %c2, %c0_13] : memref<1x18x144xf32, #tpu.memory_space<vmem>>, vector<1x16x144xf32>
    %15 = vector.shape_cast %14 : vector<1x16x144xf32> to vector<16x144xf32>
    %c2_14 = arith.constant 2 : index
    %c0_15 = arith.constant 0 : index
    %c0_16 = arith.constant 0 : index
    %16 = vector.load %arg2[%c2_14, %c0_15, %c0_16] : memref<3x144x128xf32, #tpu.memory_space<vmem>>, vector<1x144x128xf32>
    %17 = vector.shape_cast %16 : vector<1x144x128xf32> to vector<144x128xf32>
    %cst_17 = arith.constant dense<0.000000e+00> : vector<16x128xf32>
    %18 = tpu.matmul %15, %17, %cst_17 {dimension_numbers = #tpu.dot_dimension_numbers<[1], [0], [0], [1], [0, 0, 1, 1], [], []>} : vector<16x144xf32>, vector<144x128xf32>, vector<16x128xf32> -> vector<16x128xf32>
    %19 = arith.addf %13, %18 : vector<16x128xf32>
    %c0_18 = arith.constant 0 : index
    %c0_19 = arith.constant 0 : index
    %20 = vector.load %arg3[%c0_18, %c0_19] : memref<1x128xf32, #tpu.memory_space<vmem>>, vector<1x128xf32>
    %21 = vector.broadcast %20 : vector<1x128xf32> to vector<16x128xf32>
    %22 = arith.addf %19, %21 : vector<16x128xf32>
    %c0_20 = arith.constant 0 : index
    %c0_21 = arith.constant 0 : index
    %23 = vector.load %arg5[%c0_20, %c0_21] : memref<16x128xf32, #tpu.memory_space<vmem>>, vector<16x128xf32>
    tpu.vector_store %arg5[%c0_20, %c0_21], %22 {strides = array<i32>} : memref<16x128xf32, #tpu.memory_space<vmem>>, vector<16x128xf32>,
    %cst_22 = arith.constant dense<0.000000e+00> : vector<128xf32>
    %24 = vector.multi_reduction <add>, %22, %cst_22 [0] : vector<16x128xf32> to vector<128xf32>
    %25 = vector.shape_cast %24 : vector<128xf32> to vector<1x128xf32>
    %26 = arith.mulf %22, %22 : vector<16x128xf32>
    %cst_23 = arith.constant dense<0.000000e+00> : vector<128xf32>
    %27 = vector.multi_reduction <add>, %26, %cst_23 [0] : vector<16x128xf32> to vector<128xf32>
    %28 = vector.shape_cast %27 : vector<128xf32> to vector<1x128xf32>
    %c0_24 = arith.constant 0 : index
    %c0_25 = arith.constant 0 : index
    %29 = vector.load %arg6[%c0_24, %c0_25] : memref<1x128xf32, #tpu.memory_space<vmem>>, vector<1x128xf32>
    %c0_26 = arith.constant 0 : index
    %c0_27 = arith.constant 0 : index
    %30 = vector.load %arg4[%c0_26, %c0_27] : memref<128x128xf32, #tpu.memory_space<vmem>>, vector<128x128xf32>
    %cst_28 = arith.constant dense<0.000000e+00> : vector<1x128xf32>
    %31 = tpu.matmul %25, %30, %cst_28 {dimension_numbers = #tpu.dot_dimension_numbers<[1], [0], [0], [1], [0, 0, 1, 1], [], []>} : vector<1x128xf32>, vector<128x128xf32>, vector<1x128xf32> -> vector<1x128xf32>
    %32 = arith.addf %29, %31 : vector<1x128xf32>
    %c0_29 = arith.constant 0 : index
    %c0_30 = arith.constant 0 : index
    %33 = vector.load %arg6[%c0_29, %c0_30] : memref<1x128xf32, #tpu.memory_space<vmem>>, vector<1x128xf32>
    tpu.vector_store %arg6[%c0_29, %c0_30], %32 {strides = array<i32>} : memref<1x128xf32, #tpu.memory_space<vmem>>, vector<1x128xf32>,
    %c0_31 = arith.constant 0 : index
    %c0_32 = arith.constant 0 : index
    %34 = vector.load %arg7[%c0_31, %c0_32] : memref<1x128xf32, #tpu.memory_space<vmem>>, vector<1x128xf32>
    %c0_33 = arith.constant 0 : index
    %c0_34 = arith.constant 0 : index
    %35 = vector.load %arg4[%c0_33, %c0_34] : memref<128x128xf32, #tpu.memory_space<vmem>>, vector<128x128xf32>
    %cst_35 = arith.constant dense<0.000000e+00> : vector<1x128xf32>
    %36 = tpu.matmul %28, %35, %cst_35 {dimension_numbers = #tpu.dot_dimension_numbers<[1], [0], [0], [1], [0, 0, 1, 1], [], []>} : vector<1x128xf32>, vector<128x128xf32>, vector<1x128xf32> -> vector<1x128xf32>
    %37 = arith.addf %34, %36 : vector<1x128xf32>
    %c0_36 = arith.constant 0 : index
    %c0_37 = arith.constant 0 : index
    %38 = vector.load %arg7[%c0_36, %c0_37] : memref<1x128xf32, #tpu.memory_space<vmem>>, vector<1x128xf32>
    tpu.vector_store %arg7[%c0_36, %c0_37], %37 {strides = array<i32>} : memref<1x128xf32, #tpu.memory_space<vmem>>, vector<1x128xf32>,
    return
  }
  func.func @transform_0(%arg0: i32) -> (i32, i32, i32) {
    %c0_i32 = arith.constant 0 : i32
    %c0_i32_0 = arith.constant 0 : i32
    %c0_i32_1 = arith.constant 0 : i32
    return %arg0, %c0_i32, %c0_i32_0 : i32, i32, i32
  }
  func.func @transform_1(%arg0: i32) -> (i32, i32, i32) {
    %c0_i32 = arith.constant 0 : i32
    %c0_i32_0 = arith.constant 0 : i32
    %c0_i32_1 = arith.constant 0 : i32
    %c0_i32_2 = arith.constant 0 : i32
    return %c0_i32, %c0_i32_0, %c0_i32_1 : i32, i32, i32
  }
  func.func @transform_2(%arg0: i32) -> (i32, i32) {
    %c0_i32 = arith.constant 0 : i32
    %c0_i32_0 = arith.constant 0 : i32
    %c0_i32_1 = arith.constant 0 : i32
    return %c0_i32, %c0_i32_0 : i32, i32
  }
  func.func @transform_3(%arg0: i32) -> (i32, i32) {
    %c0_i32 = arith.constant 0 : i32
    %c0_i32_0 = arith.constant 0 : i32
    %c0_i32_1 = arith.constant 0 : i32
    return %c0_i32, %c0_i32_0 : i32, i32
  }
  func.func @transform_4(%arg0: i32) -> (i32, i32) {
    %c0_i32 = arith.constant 0 : i32
    %c0_i32_0 = arith.constant 0 : i32
    return %arg0, %c0_i32 : i32, i32
  }
  func.func @transform_5(%arg0: i32) -> (i32, i32) {
    %c0_i32 = arith.constant 0 : i32
    %c0_i32_0 = arith.constant 0 : i32
    %c0_i32_1 = arith.constant 0 : i32
    return %c0_i32, %c0_i32_0 : i32, i32
  }
  func.func @transform_6(%arg0: i32) -> (i32, i32) {
    %c0_i32 = arith.constant 0 : i32
    %c0_i32_0 = arith.constant 0 : i32
    %c0_i32_1 = arith.constant 0 : i32
    return %c0_i32, %c0_i32_0 : i32, i32
  }
}

module attributes {stable_mosaic.version = 11 : i64} {
  func.func @kernel(%arg0: i32, %arg1: memref<8x2x128xf32, #tpu.memory_space<vmem>>, %arg2: memref<1x128xf32, #tpu.memory_space<vmem>>, %arg3: memref<1x128xf32, #tpu.memory_space<vmem>>, %arg4: memref<1x128xf32, #tpu.memory_space<vmem>>, %arg5: memref<1x128xf32, #tpu.memory_space<vmem>>, %arg6: memref<8x2x128xf32, #tpu.memory_space<vmem>>, %arg7: memref<8x128xf32, #tpu.memory_space<vmem>>) attributes {dimension_semantics = [#tpu.dimension_semantics<parallel>], iteration_bounds = array<i64: 2>, scalar_prefetch = 0 : i64, scratch_operands = 0 : i64, tpu.core_type = #tpu.core_type<tc>, window_params = [{transform_indices = @transform_0, window_bounds = array<i64: 8, 2, 128>}, {pipeline_mode = #tpu.pipeline_mode<synchronous>, transform_indices = @transform_1, window_bounds = array<i64: 1, 128>}, {pipeline_mode = #tpu.pipeline_mode<synchronous>, transform_indices = @transform_2, window_bounds = array<i64: 1, 128>}, {pipeline_mode = #tpu.pipeline_mode<synchronous>, transform_indices = @transform_3, window_bounds = array<i64: 1, 128>}, {pipeline_mode = #tpu.pipeline_mode<synchronous>, transform_indices = @transform_4, window_bounds = array<i64: 1, 128>}, {transform_indices = @transform_5, window_bounds = array<i64: 8, 2, 128>}, {transform_indices = @transform_6, window_bounds = array<i64: 8, 128>}]} {
    %c0 = arith.constant 0 : index
    %c0_0 = arith.constant 0 : index
    %0 = vector.load %arg2[%c0, %c0_0] : memref<1x128xf32, #tpu.memory_space<vmem>>, vector<1x128xf32>
    %c0_1 = arith.constant 0 : index
    %c0_2 = arith.constant 0 : index
    %1 = vector.load %arg3[%c0_1, %c0_2] : memref<1x128xf32, #tpu.memory_space<vmem>>, vector<1x128xf32>
    %c0_3 = arith.constant 0 : index
    %c0_4 = arith.constant 0 : index
    %2 = vector.load %arg4[%c0_3, %c0_4] : memref<1x128xf32, #tpu.memory_space<vmem>>, vector<1x128xf32>
    %c0_5 = arith.constant 0 : index
    %c0_6 = arith.constant 0 : index
    %3 = vector.load %arg5[%c0_5, %c0_6] : memref<1x128xf32, #tpu.memory_space<vmem>>, vector<1x128xf32>
    %cst = arith.constant 0.001953125 : f32
    %4 = vector.broadcast %cst : f32 to vector<1x128xf32>
    %5 = arith.mulf %0, %4 : vector<1x128xf32>
    %cst_7 = arith.constant 0.001953125 : f32
    %6 = vector.broadcast %cst_7 : f32 to vector<1x128xf32>
    %7 = arith.mulf %1, %6 : vector<1x128xf32>
    %8 = arith.mulf %5, %5 : vector<1x128xf32>
    %9 = arith.subf %7, %8 : vector<1x128xf32>
    %cst_8 = arith.constant 9.99999974E-6 : f32
    %10 = vector.broadcast %cst_8 : f32 to vector<1x128xf32>
    %11 = arith.addf %9, %10 : vector<1x128xf32>
    %12 = math.rsqrt %11 : vector<1x128xf32>
    %13 = arith.mulf %2, %12 : vector<1x128xf32>
    %14 = arith.mulf %5, %13 : vector<1x128xf32>
    %15 = arith.subf %3, %14 : vector<1x128xf32>
    %c0_9 = arith.constant 0 : index
    %c0_10 = arith.constant 0 : index
    %c0_11 = arith.constant 0 : index
    %16 = vector.load %arg1[%c0_9, %c0_10, %c0_11] : memref<8x2x128xf32, #tpu.memory_space<vmem>>, vector<8x2x128xf32>
    %17 = vector.shape_cast %13 : vector<1x128xf32> to vector<1x1x128xf32>
    %18 = vector.broadcast %17 : vector<1x1x128xf32> to vector<8x2x128xf32>
    %19 = arith.mulf %16, %18 : vector<8x2x128xf32>
    %20 = vector.shape_cast %15 : vector<1x128xf32> to vector<1x1x128xf32>
    %21 = vector.broadcast %20 : vector<1x1x128xf32> to vector<8x2x128xf32>
    %22 = arith.addf %19, %21 : vector<8x2x128xf32>
    %cst_12 = arith.constant 0.000000e+00 : f32
    %23 = vector.broadcast %cst_12 : f32 to vector<8x2x128xf32>
    %24 = arith.maximumf %22, %23 : vector<8x2x128xf32>
    %c0_13 = arith.constant 0 : index
    %c0_14 = arith.constant 0 : index
    %c0_15 = arith.constant 0 : index
    %25 = vector.load %arg6[%c0_13, %c0_14, %c0_15] : memref<8x2x128xf32, #tpu.memory_space<vmem>>, vector<8x2x128xf32>
    tpu.vector_store %arg6[%c0_13, %c0_14, %c0_15], %24 {strides = array<i32>} : memref<8x2x128xf32, #tpu.memory_space<vmem>>, vector<8x2x128xf32>,
    %26 = vector.extract_strided_slice %24 {offsets = [0, 0, 0], sizes = [8, 1, 128], strides = [1, 1, 1]} : vector<8x2x128xf32> to vector<8x1x128xf32>
    %27 = vector.shape_cast %26 : vector<8x1x128xf32> to vector<8x128xf32>
    %28 = vector.extract_strided_slice %24 {offsets = [0, 1, 0], sizes = [8, 1, 128], strides = [1, 1, 1]} : vector<8x2x128xf32> to vector<8x1x128xf32>
    %29 = vector.shape_cast %28 : vector<8x1x128xf32> to vector<8x128xf32>
    %30 = arith.maximumf %27, %29 : vector<8x128xf32>
    %c0_16 = arith.constant 0 : index
    %c0_17 = arith.constant 0 : index
    %31 = vector.load %arg7[%c0_16, %c0_17] : memref<8x128xf32, #tpu.memory_space<vmem>>, vector<8x128xf32>
    tpu.vector_store %arg7[%c0_16, %c0_17], %30 {strides = array<i32>} : memref<8x128xf32, #tpu.memory_space<vmem>>, vector<8x128xf32>,
    return
  }
  func.func @transform_0(%arg0: i32) -> (i32, i32, i32) {
    %c0_i32 = arith.constant 0 : i32
    %c0_i32_0 = arith.constant 0 : i32
    %c0_i32_1 = arith.constant 0 : i32
    return %arg0, %c0_i32, %c0_i32_0 : i32, i32, i32
  }
  func.func @transform_1(%arg0: i32) -> (i32, i32) {
    %c0_i32 = arith.constant 0 : i32
    %c0_i32_0 = arith.constant 0 : i32
    %c0_i32_1 = arith.constant 0 : i32
    return %c0_i32, %c0_i32_0 : i32, i32
  }
  func.func @transform_2(%arg0: i32) -> (i32, i32) {
    %c0_i32 = arith.constant 0 : i32
    %c0_i32_0 = arith.constant 0 : i32
    %c0_i32_1 = arith.constant 0 : i32
    return %c0_i32, %c0_i32_0 : i32, i32
  }
  func.func @transform_3(%arg0: i32) -> (i32, i32) {
    %c0_i32 = arith.constant 0 : i32
    %c0_i32_0 = arith.constant 0 : i32
    %c0_i32_1 = arith.constant 0 : i32
    return %c0_i32, %c0_i32_0 : i32, i32
  }
  func.func @transform_4(%arg0: i32) -> (i32, i32) {
    %c0_i32 = arith.constant 0 : i32
    %c0_i32_0 = arith.constant 0 : i32
    %c0_i32_1 = arith.constant 0 : i32
    return %c0_i32, %c0_i32_0 : i32, i32
  }
  func.func @transform_5(%arg0: i32) -> (i32, i32, i32) {
    %c0_i32 = arith.constant 0 : i32
    %c0_i32_0 = arith.constant 0 : i32
    %c0_i32_1 = arith.constant 0 : i32
    return %arg0, %c0_i32, %c0_i32_0 : i32, i32, i32
  }
  func.func @transform_6(%arg0: i32) -> (i32, i32) {
    %c0_i32 = arith.constant 0 : i32
    %c0_i32_0 = arith.constant 0 : i32
    return %arg0, %c0_i32 : i32, i32
  }
}

</mosaic_0001>

<bundles_post_ra>
// kernel: tile.33
= control target key start
LH: loop header
LB: loop body
LE: loop exit
PB: predicated region body
PF: predicated region fallthrough
CT: control target
= control target key end

     0   :  { %s28_s0 = inlined_call_operand.vmem [shape: f32[8], index: 0, kind: input, shape index: {}]   ;;  %s29_s1 = inlined_call_operand.vmem [shape: f32[16,8], index: 1, kind: output, shape index: {}]  }
   0x1   :  { %v4_v0 = vld [vmem:[%s28_s0] ss:$0 sm:$0xff] }
   0x2   :  { %5 = vst [vmem:[%s29_s1] sm:$0xff] %v4_v0  ;;  %8 = vst [vmem:[%s29_s1 + $0x8] sm:$0xff] %v4_v0 }

// kernel: tile.34
= control target key start
LH: loop header
LB: loop body
LE: loop exit
PB: predicated region body
PF: predicated region fallthrough
CT: control target
= control target key end

     0   :  { %s133_s10 = smov 120   ;;  %s134_s11 = smov 104   ;;  %vm3_vm0 = vcmask 64512   ;;  %vm9_vm1 = vcmask 1048512   ;;  %vm15_vm2 = vcmask 982912   ;;  %vm21_vm3 = vcmask 917312   ;;  %s209_s0 = inlined_call_operand.vmem [shape: f32[16,8], index: 0, kind: input, shape index: {}]   ;;  %s210_s1 = inlined_call_operand.vmem [shape: f32[1,128], index: 1, kind: output, shape index: {}]  }
   0x1   :  { %v103_v0 = vld [vmem:[%s209_s0 + $0xf] sm:$0x1]   ;;  %v105_v1 = vld [vmem:[%s209_s0 + $0xd] sm:$0x1]   ;;  %v104_v2 = vld [vmem:[%s209_s0 + $0xe] sm:$0x1]  }
   0x2   :  { %7 = vrot.lane.b32.xlu0 %v103_v0, %s133_s10  ;;  %19 = vrot.lane.b32.xlu1 %v105_v1, %s134_s11  ;;  %v106_v3 = vld [vmem:[%s209_s0 + $0xc] sm:$0x1]   ;;  %s135_s16 = smov 112   ;;  %s136_s17 = smov 96   ;;  %v107_v4 = vld [vmem:[%s209_s0 + $0xb] sm:$0x1]  }
   0x3   :  { %v108_v5 = vld [vmem:[%s209_s0 + $0xa] sm:$0x1]   ;;  %v2_v6 = vld [vmem:[%s209_s0] sm:$0x1]   ;;  %s137_s24 = smov 88   ;;  %s138_s25 = smov 80  }
   0x4   :  { %4 = vst.msk [vmem:[#allocation0] sm:$0x1] %vm3_vm0, %v2_v6   ;;  %v109_v7 = vld [vmem:[%s209_s0 + $0x9] sm:$0x1]   ;;  %v110_v8 = vld [vmem:[%s209_s0 + $0x8] sm:$0x1]  }
   0x5   :  { %s139_s30 = smov 72   ;;  %s140_s2 = smov 64   ;;  %v111_v9 = vld [vmem:[%s209_s0 + $0x7] sm:$0x1]   ;;  %v112_v10 = vld [vmem:[%s209_s0 + $0x6] sm:$0x1]  }
   0x6   :  { %13 = vrot.lane.b32.xlu0 %v104_v2, %s135_s16  ;;  %25 = vrot.lane.b32.xlu1 %v106_v3, %s136_s17  ;;  %s141_s7 = smov 56   ;;  %s142_s8 = smov 48   ;;  %v113_v11 = vld [vmem:[%s209_s0 + $0x5] sm:$0x1]   ;;  %v114_v12 = vld [vmem:[%s209_s0 + $0x4] sm:$0x1]  }
   0x7   :  { %s143_s13 = smov 40   ;;  %s144_s14 = smov 32   ;;  %v115_v13 = vld [vmem:[%s209_s0 + $0x3] sm:$0x1]   ;;  %v116_v14 = vld [vmem:[%s209_s0 + $0x2] sm:$0x1]  }
   0x8   :  { %s145_s19 = smov 24   ;;  %s146_s20 = smov 16   ;;  %v117_v15 = vld [vmem:[%s209_s0 + $0x1] sm:$0x1]   ;;  %vm27_vm4 = vcmask 851712   ;;  %vm33_vm5 = vcmask 786112  }
   0x9   :  { %s147_s0 = smov 8   ;;  %vm39_vm6 = vcmask 720512   ;;  %vm45_vm7 = vcmask 654912   ;;  %vm51_vm8 = vcmask 589312   ;;  %vm57_vm9 = vcmask 523712  }
   0xa   :  { %31 = vrot.lane.b32.xlu0 %v107_v4, %s137_s24  ;;  %37 = vrot.lane.b32.xlu1 %v108_v5, %s138_s25  ;;  %vm63_vm10 = vcmask 458112   ;;  %vm69_vm11 = vcmask 392512   ;;  %vm75_vm12 = vcmask 326912   ;;  %vm81_vm13 = vcmask 261312  }
   0xb   :  { %vm87_vm14 = vcmask 195712   ;;  %vm93_vm15 = vcmask 130112  }
   0xe   :  { %43 = vrot.lane.b32.xlu0 %v109_v7, %s139_s30  ;;  %49 = vrot.lane.b32.xlu1 %v110_v8, %s140_s2 }
  0x12   :  { %55 = vrot.lane.b32.xlu0 %v111_v9, %s141_s7  ;;  %61 = vrot.lane.b32.xlu1 %v112_v10, %s142_s8 }
  0x16   :  { %67 = vrot.lane.b32.xlu0 %v113_v11, %s143_s13  ;;  %73 = vrot.lane.b32.xlu1 %v114_v12, %s144_s14 }
  0x1a   :  { %79 = vrot.lane.b32.xlu0 %v115_v13, %s145_s19  ;;  %85 = vrot.lane.b32.xlu1 %v116_v14, %s146_s20 }
  0x1e   :  { %91 = vrot.lane.b32.xlu0 %v117_v15, %s147_s0 }
  0x74   :  { %v8_v16 = vpop.permute.xlu0 %7   ;;  %v20_v17 = vpop.permute.xlu1 %19  }
  0x75   :  { %10 = vst.msk [vmem:[#allocation0] sm:$0x1] %vm9_vm1, %v8_v16  }
  0x78   :  { %v14_v18 = vpop.permute.xlu0 %13   ;;  %v26_v19 = vpop.permute.xlu1 %25  }
  0x79   :  { %16 = vst.msk [vmem:[#allocation0] sm:$0x1] %vm15_vm2, %v14_v18  }
  0x7a   :  { %22 = vst.msk [vmem:[#allocation0] sm:$0x1] %vm21_vm3, %v20_v17  }
  0x7b   :  { %28 = vst.msk [vmem:[#allocation0] sm:$0x1] %vm27_vm4, %v26_v19  }
  0x7c   :  { %v32_v20 = vpop.permute.xlu0 %31   ;;  %v38_v21 = vpop.permute.xlu1 %37  }
  0x7d   :  { %34 = vst.msk [vmem:[#allocation0] sm:$0x1] %vm33_vm5, %v32_v20  }
  0x7e   :  { %40 = vst.msk [vmem:[#allocation0] sm:$0x1] %vm39_vm6, %v38_v21  }
  0x80   :  { %v44_v22 = vpop.permute.xlu0 %43   ;;  %v50_v23 = vpop.permute.xlu1 %49  }
  0x81   :  { %46 = vst.msk [vmem:[#allocation0] sm:$0x1] %vm45_vm7, %v44_v22  }
  0x82   :  { %52 = vst.msk [vmem:[#allocation0] sm:$0x1] %vm51_vm8, %v50_v23  }
  0x84   :  { %v56_v24 = vpop.permute.xlu0 %55   ;;  %v62_v25 = vpop.permute.xlu1 %61  }
  0x85   :  { %58 = vst.msk [vmem:[#allocation0] sm:$0x1] %vm57_vm9, %v56_v24  }
  0x86   :  { %64 = vst.msk [vmem:[#allocation0] sm:$0x1] %vm63_vm10, %v62_v25  }
  0x88   :  { %v68_v26 = vpop.permute.xlu0 %67   ;;  %v74_v27 = vpop.permute.xlu1 %73  }
  0x89   :  { %70 = vst.msk [vmem:[#allocation0] sm:$0x1] %vm69_vm11, %v68_v26  }
  0x8a   :  { %76 = vst.msk [vmem:[#allocation0] sm:$0x1] %vm75_vm12, %v74_v27  }
  0x8c   :  { %v80_v28 = vpop.permute.xlu0 %79   ;;  %v86_v29 = vpop.permute.xlu1 %85  }
  0x8d   :  { %82 = vst.msk [vmem:[#allocation0] sm:$0x1] %vm81_vm13, %v80_v28  }
  0x8e   :  { %88 = vst.msk [vmem:[#allocation0] sm:$0x1] %vm87_vm14, %v86_v29  }
  0x90   :  { %v92_v30 = vpop.permute.xlu0 %91  }
  0x91   :  { %94 = vst.msk [vmem:[#allocation0] sm:$0x1] %vm93_vm15, %v92_v30  }
  0x98   :  { %v99_v31 = vld [vmem:[#allocation0] sm:$0x1] }
  0x99   :  { %102 = vst [vmem:[%s210_s1] sm:$0x1] %v99_v31 }

// kernel: encoder_forward.5
= control target key start
LH: loop header
LB: loop body
LE: loop exit
PB: predicated region body
PF: predicated region fallthrough
CT: control target
= control target key end

     0   :  { %s378_s18 = smov 0   ;;  %s407_s0 = inlined_call_operand.vmem [shape: f32[32,128], index: 0, kind: input, shape index: {}]   ;;  %s408_s1 = inlined_call_operand.vmem [shape: f32[1,128], index: 1, kind: input, shape index: {}]   ;;  %s409_s2 = inlined_call_operand.vmem [shape: f32[1,128], index: 2, kind: input, shape index: {}]   ;;  %s410_s3 = inlined_call_operand.vmem [shape: f32[1,128], index: 3, kind: input, shape index: {}]   ;;  %s411_s4 = inlined_call_operand.vmem [shape: f32[1,128], index: 4, kind: input, shape index: {}]   ;;  %s412_s5 = inlined_call_operand.vmem [shape: f32[32,128], index: 5, kind: output, shape index: {}]  }
   0x1 LB: > { %s319_s19 = sadd.s32 4294967295, %s346_s18   ;;  %p323_p0 = scmp.ge.s32.totalorder %s346_s18, 1  ;;  %s346_s18 = sphi %s378_s18, %s15_s18  }
   0x2   : > { %p188_p1 = scmp.lt.s32.totalorder %s346_s18, 3 }
   0x4   : > { %p189_p2 = pnand %p323_p0, %p188_p1 }
   0x5   : > { %s324_s24 = sshll.u32 (!%p189_p2), %s319_s19, 1 }
   0x6   : > { %192 = sbr.rel (%p189_p2) target bundleno = 47 (0x2f), region = 40  ;;  %p217_p3 = scmp.lt.s32.totalorder (!%p189_p2), %s324_s24, 3 }
   0xb   : > { %v228_v0 = vld [vmem:[%s408_s1] sm:$0x1]  ;;  %v244_v7 = vlaneseq  ;;  %s414_s24 = smov (!%p217_p3, %s324_s24), 3 }
   0xc   : > { %v229_v1 = vld [vmem:[%s409_s2] sm:$0x1]  ;;  %v232_v2 = vmul.f32 0.001953125, %v228_v0  ;;  %s325_s25 = sshll.u32 %s414_s24, 3 }
   0xd   : > { %v233_v3 = vmul.f32 0.001953125, %v229_v1  ;;  %v245_v8 = vshrl.u32 %v244_v7, 7  ;;  %v230_v9 = vld [vmem:[%s410_s3] sm:$0x1]  ;;  %s220_s30 = scalar_lea.vmem %s407_s0, %s325_s25  ;;  %s226_s10 = scalar_lea.vmem %s412_s5, %s325_s25 }
   0xe   : > { %v234_v4 = vmul.f32 %v232_v2, %v232_v2  ;;  %v231_v13 = vld [vmem:[%s411_s4] sm:$0x1]  ;;  %v242_v15 = vld [vmem:[%s220_s30 + $0x8] sm:$0xff] }
   0xf   : > { %v246_v10 = vsub.s32 0, %v245_v8  ;;  %v241_v14 = vld [vmem:[%s220_s30] sm:$0xff] }
  0x10   : > { %v235_v5 = vsub.f32 %v233_v3, %v234_v4 }
  0x12   : > { %v236_v6 = vadd.f32 1e-05, %v235_v5 }
  0x14   : > { %338 = vrsqrt.f32 %v236_v6 }
  0x21   : > { %v339_v11 = vpop.eup %338 }
  0x22   : > { %v238_v12 = vmul.f32 %v339_v11, %v230_v9 }
  0x24   : > { %v239_v16 = vmul.f32 %v238_v12, %v232_v2  ;;  %v247_v17 = vrot.slane %v238_v12, %v246_v10 }
  0x26   : > { %v240_v18 = vsub.f32 %v231_v13, %v239_v16  ;;  %v249_v19 = vmul.f32 %v247_v17, %v241_v14  ;;  %v250_v20 = vmul.f32 %v247_v17, %v242_v15 }
  0x28   : > { %v255_v21 = vrot.slane %v240_v18, %v246_v10 }
  0x2a   : > { %v257_v22 = vadd.f32 %v255_v21, %v249_v19  ;;  %v258_v23 = vadd.f32 %v255_v21, %v250_v20 }
  0x2c   : > { %v259_v24 = vmax.f32 %v257_v22, 0.0  ;;  %v260_v25 = vmax.f32 %v258_v23, 0.0 }
  0x2e   : > { %261 = vst [vmem:[%s226_s10] sm:$0xff] %v259_v24  ;;  %262 = vst [vmem:[%s226_s10 + $0x8] sm:$0xff] %v260_v25 }
  0x2f PF: > { %s15_s18 = sadd.s32 1, %s346_s18  }
  0x30   : > { %p12_p4 = scmp.ge.s32.totalorder %s15_s18, 4  }
  0x32   :  { %14 = sbr.rel (!%p12_p4) target bundleno = 1 (0x1), region = 70 }

// kernel: encoder_forward.4
= control target key start
LH: loop header
LB: loop body
LE: loop exit
PB: predicated region body
PF: predicated region fallthrough
CT: control target
= control target key end

     0   :  { %s1102_s21 = smov 0   ;;  %s1321_s0 = inlined_call_operand.vmem [shape: f32[2,18,72], index: 0, kind: input, shape index: {}]   ;;  %s1322_s1 = inlined_call_operand.vmem [shape: f32[3,72,128], index: 1, kind: input, shape index: {}]   ;;  %s1323_s2 = inlined_call_operand.vmem [shape: f32[1,128], index: 2, kind: input, shape index: {}]   ;;  %s1324_s3 = inlined_call_operand.vmem [shape: f32[128,128], index: 3, kind: input, shape index: {}]   ;;  %s1325_s4 = inlined_call_operand.vmem [shape: f32[32,128], index: 4, kind: output, shape index: {0}]   ;;  %s1326_s5 = inlined_call_operand.vmem [shape: f32[1,128], index: 5, kind: output, shape index: {1}]   ;;  %s1327_s6 = inlined_call_operand.vmem [shape: f32[1,128], index: 6, kind: output, shape index: {2}]  }
   0x1 LB: > { %s808_s22 = sadd.s32 4294967295, %s1062_s21   ;;  %p812_p0 = scmp.ge.s32.totalorder %s1062_s21, 1  ;;  %s1062_s21 = sphi %s1102_s21, %s17_s21  }
   0x2   : > { %p207_p1 = scmp.lt.s32.totalorder %s1062_s21, 3 }
   0x4   : > { %p208_p2 = pnand %p812_p0, %p207_p1 }
   0x5   : > { %p237_p3 = scmp.lt.s32.totalorder (!%p208_p2), %s808_s22, 1  ;;  %s814_s23 = sshll.u32 (!%p208_p2), %s808_s22, 1 }
   0x6   : > { %211 = sbr.rel (%p208_p2) target bundleno = 469 (0x1d5), region = 36  ;;  %p243_p4 = scmp.lt.s32.totalorder (!%p208_p2), %s814_s23, 3 }
   0x7   : > { %p816_p5 = scmp.ne.s32.totalorder (!%p208_p2), %s808_s22, 0 }
   0xb   : > { %s238_s24 = scalar_select %p237_p3, %s808_s22, 1 }
   0xc   : > { %s1329_s23 = smov (!%p243_p4, %s814_s23), 3  ;;  %251 = sbr.rel (%p816_p5) target bundleno = 19 (0x13), region = 40 }
   0xd   : > { %s1044_s25 = smul.u32 24, %s238_s24  ;;  %s815_s26 = sshll.u32 %s1329_s23, 3 }
   0xe   : > { %s1118_s8 = scalar_lea.vmem %s1325_s4, %s815_s26 }
   0xf   : > { %s1113_s29 = scalar_lea.vmem %s1321_s0, %s1044_s25 }
  0x11   : > { %v1064_v0 = vmov 0.0  }
  0x12   : > { %252 = vst [vmem:[%s1326_s5] sm:$0x1] %v1064_v0  ;;  %253 = vst [vmem:[%s1327_s6] sm:$0x1] %v1064_v0 }
  0x13 PF: > { %v825_v1 = vld [vmem:[%s1322_s1 + $0x88] sm:$0xff]  ;;  %v264_v2 = vld [vmem:[%s1322_s1 + $0x40] sm:$0xff]  ;;  %v263_v4 = vld [vmem:[%s1322_s1 + $0x38] sm:$0xff]  ;;  %vm277_vm0 = vcmask 588800   ;;  %v1065_v35 = vmov 0.0   ;;  %vm1066_vm1 = vmmov 0  }
  0x14   : > { %v824_v3 = vld [vmem:[%s1322_s1 + $0x80] sm:$0xff]  ;;  %911 = vmatprep.subr.mxu0 %v825_v1  ;;  %932 = vmatprep.subr.mxu1 %v264_v2  ;;  %v823_v5 = vld [vmem:[%s1322_s1 + $0x78] sm:$0xff]  ;;  %v262_v6 = vld [vmem:[%s1322_s1 + $0x30] sm:$0xff] }
  0x15   : > { %912 = vmatpush3.msra.mxu0 %v825_v1  ;;  %933 = vmatpush3.msra.mxu1 %v264_v2  ;;  %v822_v7 = vld [vmem:[%s1322_s1 + $0x70] sm:$0xff]  ;;  %v261_v8 = vld [vmem:[%s1322_s1 + $0x28] sm:$0xff]  ;;  %v260_v10 = vld [vmem:[%s1322_s1 + $0x20] sm:$0xff] }
  0x16   : > { %913 = vmatprep.subr.mxu0 %v824_v3  ;;  %934 = vmatprep.subr.mxu1 %v263_v4  ;;  %v821_v9 = vld [vmem:[%s1322_s1 + $0x68] sm:$0xff]  ;;  %v820_v11 = vld [vmem:[%s1322_s1 + $0x60] sm:$0xff]  ;;  %v259_v12 = vld [vmem:[%s1322_s1 + $0x18] sm:$0xff] }
  0x17   : > { %914 = vmatpush3.msra.mxu0 %v824_v3  ;;  %935 = vmatpush3.msra.mxu1 %v263_v4  ;;  %v819_v13 = vld [vmem:[%s1322_s1 + $0x58] sm:$0xff]  ;;  %v258_v14 = vld [vmem:[%s1322_s1 + $0x10] sm:$0xff]  ;;  %v257_v16 = vld [vmem:[%s1322_s1 + $0x8] sm:$0xff] }
  0x18   : > { %915 = vmatprep.subr.mxu0 %v823_v5  ;;  %936 = vmatprep.subr.mxu1 %v262_v6  ;;  %v818_v15 = vld [vmem:[%s1322_s1 + $0x50] sm:$0xff]  ;;  %v817_v17 = vld [vmem:[%s1322_s1 + $0x48] sm:$0xff]  ;;  %v256_v18 = vld [vmem:[%s1322_s1] sm:$0xff] }
  0x19   : > { %916 = vmatpush3.msra.mxu0 %v823_v5  ;;  %937 = vmatpush3.msra.mxu1 %v262_v6  ;;  %v265_v19 = vld [vmem:[%s1113_s29 + $0x1] sm:$0xff]  ;;  %v266_v21 = vld [vmem:[%s1113_s29 + $0x9] sm:$0xff]  ;;  %v835_v27 = vld [vmem:[%s1322_s1 + $0xb8] sm:$0xff] }
  0x1a   : > { %917 = vmatprep.subr.mxu0 %v822_v7  ;;  %938 = vmatprep.subr.mxu1 %v261_v8  ;;  %v254_v20 = vld [vmem:[%s1113_s29] sm:$0xff]  ;;  %v255_v22 = vld [vmem:[%s1113_s29 + $0x8] sm:$0xff]  ;;  %v838_v23 = vld [vmem:[%s1322_s1 + $0xd0] sm:$0xff] }
  0x1b   : > { %918 = vmatpush3.msra.mxu0 %v822_v7  ;;  %939 = vmatpush3.msra.mxu1 %v261_v8  ;;  %v440_v24 = vld [vmem:[%s1113_s29 + $0x2] sm:$0xff]  ;;  %v834_v28 = vld [vmem:[%s1322_s1 + $0xb0] sm:$0xff]  ;;  %v831_v31 = vld [vmem:[%s1322_s1 + $0x98] sm:$0xff] }
  0x1c   : > { %919 = vmatprep.subr.mxu0 %v821_v9  ;;  %940 = vmatprep.subr.mxu1 %v260_v10  ;;  %v837_v25 = vld [vmem:[%s1322_s1 + $0xc8] sm:$0xff]  ;;  %v836_v26 = vld [vmem:[%s1322_s1 + $0xc0] sm:$0xff]  ;;  %v830_v32 = vld [vmem:[%s1322_s1 + $0x90] sm:$0xff] }
  0x1d   : > { %920 = vmatpush3.msra.mxu0 %v821_v9  ;;  %941 = vmatpush3.msra.mxu1 %v260_v10  ;;  %v833_v29 = vld [vmem:[%s1322_s1 + $0xa8] sm:$0xff]  ;;  %v832_v30 = vld [vmem:[%s1322_s1 + $0xa0] sm:$0xff]  ;;  %v578_v34 = vld [vmem:[%s1324_s3 + $0x78] sm:$0xff] }
  0x1e   : > { %921 = vmatprep.subr.mxu0 %v820_v11  ;;  %942 = vmatprep.subr.mxu1 %v259_v12  ;;  %v441_v33 = vld [vmem:[%s1113_s29 + $0xa] sm:$0xff]  ;;  %v575_v38 = vld [vmem:[%s1324_s3 + $0x60] sm:$0xff]  ;;  %v574_v39 = vld [vmem:[%s1324_s3 + $0x58] sm:$0xff] }
  0x1f   : > { %922 = vmatpush3.msra.mxu0 %v820_v11  ;;  %943 = vmatpush3.msra.mxu1 %v259_v12  ;;  %v577_v36 = vld [vmem:[%s1324_s3 + $0x70] sm:$0xff]  ;;  %v576_v37 = vld [vmem:[%s1324_s3 + $0x68] sm:$0xff]  ;;  %v571_v42 = vld [vmem:[%s1324_s3 + $0x40] sm:$0xff] }
  0x20   : > { %923 = vmatprep.subr.mxu0 %v819_v13  ;;  %944 = vmatprep.subr.mxu1 %v258_v14  ;;  %v573_v40 = vld [vmem:[%s1324_s3 + $0x50] sm:$0xff]  ;;  %v572_v41 = vld [vmem:[%s1324_s3 + $0x48] sm:$0xff]  ;;  %v570_v43 = vld [vmem:[%s1324_s3 + $0x38] sm:$0xff] }
  0x21   : > { %924 = vmatpush3.msra.mxu0 %v819_v13  ;;  %945 = vmatpush3.msra.mxu1 %v258_v14  ;;  %v569_v44 = vld [vmem:[%s1324_s3 + $0x30] sm:$0xff]  ;;  %v568_v45 = vld [vmem:[%s1324_s3 + $0x28] sm:$0xff]  ;;  %v567_v46 = vld [vmem:[%s1324_s3 + $0x20] sm:$0xff] }
  0x22   : > { %925 = vmatprep.subr.mxu0 %v818_v15  ;;  %946 = vmatprep.subr.mxu1 %v257_v16  ;;  %v566_v47 = vld [vmem:[%s1324_s3 + $0x18] sm:$0xff]  ;;  %v565_v48 = vld [vmem:[%s1324_s3 + $0x10] sm:$0xff]  ;;  %v564_v49 = vld [vmem:[%s1324_s3 + $0x8] sm:$0xff] }
  0x23   : > { %926 = vmatpush3.msra.mxu0 %v818_v15  ;;  %947 = vmatpush3.msra.mxu1 %v257_v16  ;;  %v563_v50 = vld [vmem:[%s1324_s3] sm:$0xff] }
  0x24   : > { %927 = vmatprep.subr.mxu0 %v817_v17  ;;  %948 = vmatprep.subr.mxu1 %v256_v18  ;;  %v841_v57 = vld [vmem:[%s1323_s2] ss:$0 sm:$0xff] }
  0x25   : > { %928 = vmatpush3.msra.mxu0 %v817_v17  ;;  %929 = vmatprep.mubr.msk.f32.mxu0 %vm277_vm0, %v265_v19  ;;  %v562_v16 = vld [vmem:[%s1326_s5] sm:$0x1] }
  0x26   : > { %949 = vmatpush3.msra.mxu1 %v256_v18  ;;  %950 = vmatprep.mubr.msk.f32.mxu1 %vm277_vm0, %v254_v20  ;;  %v651_v18 = vld [vmem:[%s1327_s6] sm:$0x1] }
  0x27   : > { %930 = vmatmul.mubr.msk.f32.vlgmr.msra.gmra.mxu0 %vm277_vm0, %v266_v21  ;;  %951 = vmatmul.mubr.msk.f32.vlgmr.msra.gmra.mxu1 %vm277_vm0, %v255_v22 }
  0x28   : > { %953 = vmatprep.subr.mxu0 %v838_v23  ;;  %971 = vmatprep.mubr.msk.f32.mxu0 %vm277_vm0, %v440_v24 }
  0x29   : > { %954 = vmatpush3.msra.mxu0 %v838_v23  ;;  %974 = vmatprep.subr.mxu1 %v1065_v35 }
  0x2a   : > { %955 = vmatprep.subr.mxu0 %v837_v25  ;;  %975 = vmatpush3.msra.mxu1 %v578_v34 }
  0x2b   : > { %956 = vmatpush3.msra.mxu0 %v837_v25  ;;  %976 = vmatprep.subr.mxu1 %v1065_v35 }
  0x2c   : > { %957 = vmatprep.subr.mxu0 %v836_v26  ;;  %977 = vmatpush3.msra.mxu1 %v577_v36 }
  0x2d   : > { %958 = vmatpush3.msra.mxu0 %v836_v26  ;;  %978 = vmatprep.subr.mxu1 %v1065_v35 }
  0x2e   : > { %959 = vmatprep.subr.mxu0 %v835_v27  ;;  %979 = vmatpush3.msra.mxu1 %v576_v37 }
  0x2f   : > { %960 = vmatpush3.msra.mxu0 %v835_v27  ;;  %980 = vmatprep.subr.mxu1 %v1065_v35 }
  0x30   : > { %961 = vmatprep.subr.mxu0 %v834_v28  ;;  %981 = vmatpush3.msra.mxu1 %v575_v38 }
  0x31   : > { %962 = vmatpush3.msra.mxu0 %v834_v28  ;;  %982 = vmatprep.subr.mxu1 %v1065_v35 }
  0x32   : > { %963 = vmatprep.subr.mxu0 %v833_v29  ;;  %983 = vmatpush3.msra.mxu1 %v574_v39 }
  0x33   : > { %964 = vmatpush3.msra.mxu0 %v833_v29  ;;  %984 = vmatprep.subr.mxu1 %v1065_v35 }
  0x34   : > { %965 = vmatprep.subr.mxu0 %v832_v30  ;;  %985 = vmatpush3.msra.mxu1 %v573_v40 }
  0x35   : > { %966 = vmatpush3.msra.mxu0 %v832_v30  ;;  %986 = vmatprep.subr.mxu1 %v1065_v35 }
  0x36   : > { %967 = vmatprep.subr.mxu0 %v831_v31  ;;  %987 = vmatpush3.msra.mxu1 %v572_v41 }
  0x37   : > { %968 = vmatpush3.msra.mxu0 %v831_v31  ;;  %988 = vmatprep.subr.mxu1 %v1065_v35 }
  0x38   : > { %969 = vmatprep.subr.mxu0 %v830_v32  ;;  %989 = vmatpush3.msra.mxu1 %v571_v42 }
  0x39   : > { %970 = vmatpush3.msra.mxu0 %v830_v32  ;;  %990 = vmatprep.subr.mxu1 %v1065_v35 }
  0x3a   : > { %972 = vmatmul.mubr.msk.f32.vlgmr.msra.gmra.mxu0 %vm277_vm0, %v441_v33  ;;  %1009 = vmatprep.subr.mxu0 %v1065_v35 }
  0x3b   : > { %1010 = vmatpush3.msra.mxu0 %v578_v34  ;;  %991 = vmatpush3.msra.mxu1 %v570_v43 }
  0x3c   : > { %1011 = vmatprep.subr.mxu0 %v1065_v35  ;;  %992 = vmatprep.subr.mxu1 %v1065_v35 }
  0x3d   : > { %1012 = vmatpush3.msra.mxu0 %v577_v36  ;;  %993 = vmatpush3.msra.mxu1 %v569_v44 }
  0x3e   : > { %1013 = vmatprep.subr.mxu0 %v1065_v35  ;;  %994 = vmatprep.subr.mxu1 %v1065_v35 }
  0x3f   : > { %1014 = vmatpush3.msra.mxu0 %v576_v37  ;;  %995 = vmatpush3.msra.mxu1 %v568_v45 }
  0x40   : > { %1015 = vmatprep.subr.mxu0 %v1065_v35  ;;  %996 = vmatprep.subr.mxu1 %v1065_v35 }
  0x41   : > { %1016 = vmatpush3.msra.mxu0 %v575_v38  ;;  %997 = vmatpush3.msra.mxu1 %v567_v46 }
  0x42   : > { %1017 = vmatprep.subr.mxu0 %v1065_v35  ;;  %998 = vmatprep.subr.mxu1 %v1065_v35 }
  0x43   : > { %1018 = vmatpush3.msra.mxu0 %v574_v39  ;;  %999 = vmatpush3.msra.mxu1 %v566_v47 }
  0x44   : > { %1019 = vmatprep.subr.mxu0 %v1065_v35  ;;  %1000 = vmatprep.subr.mxu1 %v1065_v35 }
  0x45   : > { %1020 = vmatpush3.msra.mxu0 %v573_v40  ;;  %1001 = vmatpush3.msra.mxu1 %v565_v48 }
  0x46   : > { %1021 = vmatprep.subr.mxu0 %v1065_v35  ;;  %1002 = vmatprep.subr.mxu1 %v1065_v35 }
  0x47   : > { %1022 = vmatpush3.msra.mxu0 %v572_v41  ;;  %1003 = vmatpush3.msra.mxu1 %v564_v49 }
  0x48   : > { %1023 = vmatprep.subr.mxu0 %v1065_v35  ;;  %1006 = vmatprep.mubr.msk.f32.mxu1 %vm1066_vm1, %v1065_v35 }
  0x49   : > { %1024 = vmatpush3.msra.mxu0 %v571_v42  ;;  %1004 = vmatprep.subr.mxu1 %v1065_v35 }
  0x4a   : > { %1025 = vmatprep.subr.mxu0 %v1065_v35  ;;  %1005 = vmatpush3.msra.mxu1 %v563_v50 }
  0x4b   : > { %1026 = vmatpush3.msra.mxu0 %v570_v43  ;;  %1041 = vmatprep.mubr.msk.f32.mxu0 %vm1066_vm1, %v1065_v35 }
  0x4c   : > { %1027 = vmatprep.subr.mxu0 %v1065_v35 }
  0x4d   : > { %1028 = vmatpush3.msra.mxu0 %v569_v44 }
  0x4e   : > { %1029 = vmatprep.subr.mxu0 %v1065_v35 }
  0x4f   : > { %1030 = vmatpush3.msra.mxu0 %v568_v45 }
  0x50   : > { %1031 = vmatprep.subr.mxu0 %v1065_v35 }
  0x51   : > { %1032 = vmatpush3.msra.mxu0 %v567_v46 }
  0x52   : > { %1033 = vmatprep.subr.mxu0 %v1065_v35 }
  0x53   : > { %1034 = vmatpush3.msra.mxu0 %v566_v47 }
  0x54   : > { %1035 = vmatprep.subr.mxu0 %v1065_v35 }
  0x55   : > { %1036 = vmatpush3.msra.mxu0 %v565_v48 }
  0x56   : > { %1037 = vmatprep.subr.mxu0 %v1065_v35 }
  0x57   : > { %1038 = vmatpush3.msra.mxu0 %v564_v49 }
  0x58   : > { %1039 = vmatprep.subr.mxu0 %v1065_v35 }
  0x59   : > { %1040 = vmatpush3.msra.mxu0 %v563_v50 }
  0xe7   : > { %v931_v51 = vpop.f32.mrf.mxu0  ;;  %v952_v52 = vpop.f32.mrf.mxu1 }
  0xe8   : > { %v437_v55 = vadd.f32 %v952_v52, %v931_v51 }
  0xe9   : > { %v350_v53 = vpop.f32.mrf.mxu0  ;;  %v431_v54 = vpop.f32.mrf.mxu1 }
  0xea   : > { %v432_v58 = vadd.f32 %v431_v54, %v350_v53 }
  0xfa   : > { %v973_v56 = vpop.f32.mrf.mxu0 }
  0xfb   : > { %v534_v59 = vadd.f32 %v973_v56, %v437_v55 }
  0xfc   : > { %v524_v60 = vpop.f32.mrf.mxu0 }
  0xfd   : > { %v543_v61 = vadd.f32 %v841_v57, %v534_v59  ;;  %v533_v62 = vadd.f32 %v524_v60, %v432_v58 }
  0xff   : > { %v542_v63 = vadd.f32 %v841_v57, %v533_v62  ;;  %v554_v0 = vmul.f32 %v543_v61, %v543_v61  ;;  %545 = vst [vmem:[%s1118_s8 + $0x8] sm:$0xff] %v543_v61 }
 0x101   : > { %544 = vst [vmem:[%s1118_s8] sm:$0xff] %v542_v63  ;;  %v546_v1 = vadd.f32 %v543_v61, %v542_v63  ;;  %v553_v2 = vmul.f32 %v542_v63, %v542_v63 }
 0x103   : > { %v547_v3 = vrot.slane %v546_v1, 4  ;;  %v555_v4 = vadd.f32 %v554_v0, %v553_v2 }
 0x105   : > { %v548_v5 = vadd.f32 %v547_v3, %v546_v1  ;;  %v556_v6 = vrot.slane %v555_v4, 4 }
 0x107   : > { %v549_v7 = vrot.slane %v548_v5, 2  ;;  %v557_v8 = vadd.f32 %v556_v6, %v555_v4 }
 0x109   : > { %v550_v9 = vadd.f32 %v549_v7, %v548_v5  ;;  %v558_v10 = vrot.slane %v557_v8, 2 }
 0x10b   : > { %v551_v11 = vrot.slane %v550_v9, 1  ;;  %v559_v12 = vadd.f32 %v558_v10, %v557_v8 }
 0x10d   : > { %v552_v13 = vadd.f32 %v551_v11, %v550_v9  ;;  %v560_v14 = vrot.slane %v559_v12, 1 }
 0x10f   : > { %1007 = vmatmul.mubr.f32.vlgmr.msra.gmra.mxu1 %v552_v13  ;;  %v561_v15 = vadd.f32 %v560_v14, %v559_v12 }
 0x111   : > { %1042 = vmatmul.mubr.f32.vlgmr.msra.gmra.mxu0 %v561_v15 }
 0x1cf   : > { %v645_v17 = vpop.f32.mrf.mxu1 }
 0x1d0   : > { %v649_v19 = vadd.f32 %v645_v17, %v562_v16 }
 0x1d1   : > { %v1008_v20 = vpop.f32.mrf.mxu1  ;;  %v734_v21 = vpop.f32.mrf.mxu0 }
 0x1d2   : > { %650 = vst [vmem:[%s1326_s5] sm:$0x1] %v649_v19  ;;  %v738_v22 = vadd.f32 %v734_v21, %v651_v18 }
 0x1d3   : > { %v1043_v23 = vpop.f32.mrf.mxu0 }
 0x1d4   : > { %739 = vst [vmem:[%s1327_s6] sm:$0x1] %v738_v22 }
 0x1d5 PF: > { %s17_s21 = sadd.s32 1, %s1062_s21  }
 0x1d6   : > { %p14_p6 = scmp.ge.s32.totalorder %s17_s21, 4  }
 0x1d8   :  { %16 = sbr.rel (!%p14_p6) target bundleno = 1 (0x1), region = 88 }

// kernel: encoder_forward.6
= control target key start
LH: loop header
LB: loop body
LE: loop exit
PB: predicated region body
PF: predicated region fallthrough
CT: control target
= control target key end

     0   :  { %s1088_s21 = smov 0   ;;  %s1536_s0 = inlined_call_operand.vmem [shape: f32[2,18,144], index: 0, kind: input, shape index: {}]   ;;  %s1537_s1 = inlined_call_operand.vmem [shape: f32[3,144,128], index: 1, kind: input, shape index: {}]   ;;  %s1538_s2 = inlined_call_operand.vmem [shape: f32[1,128], index: 2, kind: input, shape index: {}]   ;;  %s1539_s3 = inlined_call_operand.vmem [shape: f32[128,128], index: 3, kind: input, shape index: {}]   ;;  %s1540_s4 = inlined_call_operand.vmem [shape: f32[32,128], index: 4, kind: output, shape index: {0}]   ;;  %s1541_s5 = inlined_call_operand.vmem [shape: f32[1,128], index: 5, kind: output, shape index: {1}]   ;;  %s1542_s6 = inlined_call_operand.vmem [shape: f32[1,128], index: 6, kind: output, shape index: {2}]  }
   0x1 LB: > { %s872_s22 = sadd.s32 4294967295, %s1048_s21   ;;  %p876_p0 = scmp.ge.s32.totalorder %s1048_s21, 1  ;;  %s1048_s21 = sphi %s1088_s21, %s17_s21  }
   0x2   : > { %p207_p1 = scmp.lt.s32.totalorder %s1048_s21, 3 }
   0x4   : > { %p208_p2 = pnand %p876_p0, %p207_p1 }
   0x5   : > { %p237_p3 = scmp.lt.s32.totalorder (!%p208_p2), %s872_s22, 1  ;;  %s878_s23 = sshll.u32 (!%p208_p2), %s872_s22, 1 }
   0x6   : > { %211 = sbr.rel (%p208_p2) target bundleno = 536 (0x218), region = 36  ;;  %p243_p4 = scmp.lt.s32.totalorder (!%p208_p2), %s878_s23, 3 }
   0x7   : > { %p880_p5 = scmp.ne.s32.totalorder (!%p208_p2), %s872_s22, 0 }
   0xb   : > { %s238_s24 = scalar_select %p237_p3, %s872_s22, 1 }
   0xc   : > { %s1544_s23 = smov (!%p243_p4, %s878_s23), 3  ;;  %251 = sbr.rel (%p880_p5) target bundleno = 19 (0x13), region = 40 }
   0xd   : > { %s1030_s25 = smul.u32 48, %s238_s24  ;;  %s879_s26 = sshll.u32 %s1544_s23, 3 }
   0xe   : > { %s1104_s8 = scalar_lea.vmem %s1540_s4, %s879_s26 }
   0xf   : > { %s1099_s29 = scalar_lea.vmem %s1536_s0, %s1030_s25 }
  0x11   : > { %v1050_v0 = vmov 0.0  }
  0x12   : > { %252 = vst [vmem:[%s1541_s5] sm:$0x1] %v1050_v0  ;;  %253 = vst [vmem:[%s1542_s6] sm:$0x1] %v1050_v0 }
  0x13 PF: > { %v896_v1 = vld [vmem:[%s1537_s1 + $0x108] sm:$0xff]  ;;  %v273_v2 = vld [vmem:[%s1537_s1 + $0x78] sm:$0xff]  ;;  %v1051_v3 = vmov 0.0   ;;  %v895_v4 = vld [vmem:[%s1537_s1 + $0x100] sm:$0xff]  ;;  %vm305_vm0 = vcmask 1046528   ;;  %vm318_vm1 = vcmask 130048  }
  0x14   : > { %323 = vmatprep.subr.mxu0 %v1051_v3  ;;  %403 = vmatprep.subr.mxu1 %v1051_v3  ;;  %v272_v5 = vld [vmem:[%s1537_s1 + $0x70] sm:$0xff]  ;;  %v894_v6 = vld [vmem:[%s1537_s1 + $0xf8] sm:$0xff]  ;;  %v271_v7 = vld [vmem:[%s1537_s1 + $0x68] sm:$0xff]  ;;  %vm505_vm2 = vcmask 1045504   ;;  %vm1052_vm3 = vmmov 0  }
  0x15   : > { %324 = vmatpush1.msra.mxu0 %v896_v1  ;;  %404 = vmatpush1.msra.mxu1 %v273_v2  ;;  %v893_v8 = vld [vmem:[%s1537_s1 + $0xf0] sm:$0xff]  ;;  %v270_v9 = vld [vmem:[%s1537_s1 + $0x60] sm:$0xff]  ;;  %v892_v10 = vld [vmem:[%s1537_s1 + $0xe8] sm:$0xff] }
  0x16   : > { %325 = vmatprep.subr.mxu0 %v1051_v3  ;;  %405 = vmatprep.subr.mxu1 %v1051_v3  ;;  %v269_v11 = vld [vmem:[%s1537_s1 + $0x58] sm:$0xff]  ;;  %v891_v12 = vld [vmem:[%s1537_s1 + $0xe0] sm:$0xff]  ;;  %v268_v13 = vld [vmem:[%s1537_s1 + $0x50] sm:$0xff] }
  0x17   : > { %326 = vmatpush1.msra.mxu0 %v895_v4  ;;  %406 = vmatpush1.msra.mxu1 %v272_v5  ;;  %v890_v14 = vld [vmem:[%s1537_s1 + $0xd8] sm:$0xff]  ;;  %v267_v15 = vld [vmem:[%s1537_s1 + $0x48] sm:$0xff]  ;;  %v889_v16 = vld [vmem:[%s1537_s1 + $0xd0] sm:$0xff] }
  0x18   : > { %327 = vmatprep.subr.mxu0 %v1051_v3  ;;  %407 = vmatprep.subr.mxu1 %v1051_v3  ;;  %v266_v17 = vld [vmem:[%s1537_s1 + $0x40] sm:$0xff]  ;;  %v888_v18 = vld [vmem:[%s1537_s1 + $0xc8] sm:$0xff]  ;;  %v265_v19 = vld [vmem:[%s1537_s1 + $0x38] sm:$0xff] }
  0x19   : > { %328 = vmatpush1.msra.mxu0 %v894_v6  ;;  %408 = vmatpush1.msra.mxu1 %v271_v7  ;;  %v887_v20 = vld [vmem:[%s1537_s1 + $0xc0] sm:$0xff]  ;;  %v264_v21 = vld [vmem:[%s1537_s1 + $0x30] sm:$0xff]  ;;  %v886_v22 = vld [vmem:[%s1537_s1 + $0xb8] sm:$0xff] }
  0x1a   : > { %329 = vmatprep.subr.mxu0 %v1051_v3  ;;  %409 = vmatprep.subr.mxu1 %v1051_v3  ;;  %v263_v23 = vld [vmem:[%s1537_s1 + $0x28] sm:$0xff]  ;;  %v885_v24 = vld [vmem:[%s1537_s1 + $0xb0] sm:$0xff]  ;;  %v262_v25 = vld [vmem:[%s1537_s1 + $0x20] sm:$0xff] }
  0x1b   : > { %330 = vmatpush1.msra.mxu0 %v893_v8  ;;  %410 = vmatpush1.msra.mxu1 %v270_v9  ;;  %v884_v26 = vld [vmem:[%s1537_s1 + $0xa8] sm:$0xff]  ;;  %v261_v27 = vld [vmem:[%s1537_s1 + $0x18] sm:$0xff]  ;;  %v883_v28 = vld [vmem:[%s1537_s1 + $0xa0] sm:$0xff] }
  0x1c   : > { %331 = vmatprep.subr.mxu0 %v1051_v3  ;;  %411 = vmatprep.subr.mxu1 %v1051_v3  ;;  %v260_v29 = vld [vmem:[%s1537_s1 + $0x10] sm:$0xff]  ;;  %v1223_v30 = vld [vmem:[%s1099_s29 + $0x18] sm:$0xff]  ;;  %v277_v31 = vld [vmem:[%s1099_s29 + $0x8] sm:$0xfe] }
  0x1d   : > { %332 = vmatpush1.msra.mxu0 %v892_v10  ;;  %412 = vmatpush1.msra.mxu1 %v269_v11  ;;  %v882_v32 = vld [vmem:[%s1537_s1 + $0x98] sm:$0xff]  ;;  %v259_v33 = vld [vmem:[%s1537_s1 + $0x8] sm:$0xff]  ;;  %v1235_v34 = vld [vmem:[%s1099_s29 + $0x10] sm:$0xff]  ;;  %v309_v36 = vrot.slane %v277_v31, 1  ;;  %v310_v37 = vrot.slane %v1223_v30, 1  ;;  %v510_v58 = vrot.slane %v1223_v30, 2 }
  0x1e   : > { %333 = vmatprep.subr.mxu0 %v1051_v3  ;;  %413 = vmatprep.subr.mxu1 %v1051_v3  ;;  %v276_v35 = vld [vmem:[%s1099_s29] sm:$0xfe]  ;;  %v881_v38 = vld [vmem:[%s1537_s1 + $0x90] sm:$0xff]  ;;  %v307_v41 = vrot.slane %v1235_v34, 1  ;;  %v279_v42 = vld [vmem:[%s1099_s29 + $0x28] sm:$0x1] }
  0x1f   : > { %334 = vmatpush1.msra.mxu0 %v891_v12  ;;  %414 = vmatpush1.msra.mxu1 %v268_v13  ;;  %v258_v39 = vld [vmem:[%s1537_s1] sm:$0xff]  ;;  %v306_v40 = vrot.slane %v276_v35, 1  ;;  %v898_v43 = vld [vmem:[%s1537_s1 + $0x118] sm:$0xff]  ;;  %v275_v44 = vld [vmem:[%s1537_s1 + $0x88] sm:$0xff]  ;;  %v311_v45 = vsel %vm305_vm0, %v309_v36, %v310_v37  ;;  %v314_v48 = vrot.slane %v279_v42, 1 }
  0x20   : > { %335 = vmatprep.subr.mxu0 %v1051_v3  ;;  %415 = vmatprep.subr.mxu1 %v1051_v3  ;;  %v278_v46 = vld [vmem:[%s1099_s29 + $0x20] sm:$0x1]  ;;  %v897_v47 = vld [vmem:[%s1537_s1 + $0x110] sm:$0xff]  ;;  %v479_v51 = vld [vmem:[%s1099_s29 + $0x8] sm:$0xfc] }
  0x21   : > { %336 = vmatpush1.msra.mxu0 %v890_v14  ;;  %416 = vmatpush1.msra.mxu1 %v267_v15  ;;  %v308_v49 = vsel %vm305_vm0, %v306_v40, %v307_v41  ;;  %v274_v50 = vld [vmem:[%s1537_s1 + $0x80] sm:$0xff]  ;;  %v255_v52 = vld [vmem:[%s1099_s29 + $0x8] sm:$0xff]  ;;  %v312_v53 = vrot.slane %v278_v46, 1  ;;  %v918_v55 = vld [vmem:[%s1537_s1 + $0x198] sm:$0xff]  ;;  %v315_v56 = vsel %vm305_vm0, %v310_v37, %v314_v48  ;;  %v509_v57 = vrot.slane %v479_v51, 2 }
  0x22   : > { %337 = vmatprep.subr.mxu0 %v1051_v3  ;;  %417 = vmatprep.subr.mxu1 %v1051_v3  ;;  %v254_v54 = vld [vmem:[%s1099_s29] sm:$0xff]  ;;  %v917_v59 = vld [vmem:[%s1537_s1 + $0x190] sm:$0xff]  ;;  %v916_v61 = vld [vmem:[%s1537_s1 + $0x188] sm:$0xff] }
  0x23   : > { %338 = vmatpush1.msra.mxu0 %v889_v16  ;;  %418 = vmatpush1.msra.mxu1 %v266_v17  ;;  %v313_v60 = vsel %vm305_vm0, %v307_v41, %v312_v53  ;;  %v511_v62 = vsel %vm505_vm2, %v509_v57, %v510_v58  ;;  %v915_v63 = vld [vmem:[%s1537_s1 + $0x180] sm:$0xff]  ;;  %v914_v0 = vld [vmem:[%s1537_s1 + $0x178] sm:$0xff]  ;;  %v913_v1 = vld [vmem:[%s1537_s1 + $0x170] sm:$0xff]  ;;  %v507_v16 = vrot.slane %v1235_v34, 2 }
  0x24   : > { %339 = vmatprep.subr.mxu0 %v1051_v3  ;;  %419 = vmatprep.subr.mxu1 %v1051_v3  ;;  %v912_v2 = vld [vmem:[%s1537_s1 + $0x168] sm:$0xff]  ;;  %v911_v4 = vld [vmem:[%s1537_s1 + $0x160] sm:$0xff]  ;;  %v910_v5 = vld [vmem:[%s1537_s1 + $0x158] sm:$0xff] }
  0x25   : > { %340 = vmatpush1.msra.mxu0 %v888_v18  ;;  %420 = vmatpush1.msra.mxu1 %v265_v19  ;;  %v909_v6 = vld [vmem:[%s1537_s1 + $0x150] sm:$0xff]  ;;  %v908_v7 = vld [vmem:[%s1537_s1 + $0x148] sm:$0xff]  ;;  %v907_v8 = vld [vmem:[%s1537_s1 + $0x140] sm:$0xff] }
  0x26   : > { %341 = vmatprep.subr.mxu0 %v1051_v3  ;;  %421 = vmatprep.subr.mxu1 %v1051_v3  ;;  %v906_v9 = vld [vmem:[%s1537_s1 + $0x138] sm:$0xff]  ;;  %v905_v10 = vld [vmem:[%s1537_s1 + $0x130] sm:$0xff]  ;;  %v904_v11 = vld [vmem:[%s1537_s1 + $0x128] sm:$0xff] }
  0x27   : > { %342 = vmatpush1.msra.mxu0 %v887_v20  ;;  %422 = vmatpush1.msra.mxu1 %v264_v21  ;;  %v478_v12 = vld [vmem:[%s1099_s29] sm:$0xfc]  ;;  %v481_v13 = vld [vmem:[%s1099_s29 + $0x28] sm:$0x3]  ;;  %v480_v19 = vld [vmem:[%s1099_s29 + $0x20] sm:$0x3] }
  0x28   : > { %343 = vmatprep.subr.mxu0 %v1051_v3  ;;  %423 = vmatprep.subr.mxu1 %v1051_v3  ;;  %v903_v14 = vld [vmem:[%s1537_s1 + $0x120] sm:$0xff]  ;;  %v506_v15 = vrot.slane %v478_v12, 2  ;;  %v920_v17 = vld [vmem:[%s1537_s1 + $0x1a8] sm:$0xff]  ;;  %v514_v18 = vrot.slane %v481_v13, 2  ;;  %v1456_v37 = vld [vmem:[%s1539_s3 + $0x18] sm:$0xff] }
  0x29   : > { %344 = vmatpush1.msra.mxu0 %v886_v22  ;;  %424 = vmatpush1.msra.mxu1 %v263_v23  ;;  %v919_v20 = vld [vmem:[%s1537_s1 + $0x1a0] sm:$0xff]  ;;  %v512_v22 = vrot.slane %v480_v19, 2  ;;  %v1414_v31 = vld [vmem:[%s1539_s3 + $0x48] sm:$0xff] }
  0x2a   : > { %345 = vmatprep.subr.mxu0 %v1051_v3  ;;  %425 = vmatprep.subr.mxu1 %v1051_v3  ;;  %v508_v21 = vsel %vm505_vm2, %v506_v15, %v507_v16  ;;  %v515_v23 = vsel %vm505_vm2, %v510_v58, %v514_v18  ;;  %v1442_v35 = vld [vmem:[%s1539_s3 + $0x28] sm:$0xff]  ;;  %v1449_v36 = vld [vmem:[%s1539_s3 + $0x20] sm:$0xff] }
  0x2b   : > { %346 = vmatpush1.msra.mxu0 %v885_v24  ;;  %426 = vmatpush1.msra.mxu1 %v262_v25  ;;  %v513_v24 = vsel %vm505_vm2, %v507_v16, %v512_v22  ;;  %v1372_v25 = vld [vmem:[%s1539_s3 + $0x78] sm:$0xff]  ;;  %v1476_v40 = vld [vmem:[%s1539_s3] sm:$0xff] }
  0x2c   : > { %347 = vmatprep.subr.mxu0 %v1051_v3  ;;  %427 = vmatprep.subr.mxu1 %v1051_v3  ;;  %v923_v51 = vld [vmem:[%s1538_s2] ss:$0 sm:$0xff] }
  0x2d   : > { %348 = vmatpush1.msra.mxu0 %v884_v26  ;;  %428 = vmatpush1.msra.mxu1 %v261_v27  ;;  %v1377_v26 = vld [vmem:[%s1539_s3 + $0x70] sm:$0xff]  ;;  %v1384_v27 = vld [vmem:[%s1539_s3 + $0x68] sm:$0xff]  ;;  %v626_v13 = vld [vmem:[%s1541_s5] sm:$0x1] }
  0x2e   : > { %349 = vmatprep.subr.mxu0 %v1051_v3  ;;  %429 = vmatprep.subr.mxu1 %v1051_v3 }
  0x2f   : > { %350 = vmatpush1.msra.mxu0 %v883_v28  ;;  %430 = vmatpush1.msra.mxu1 %v260_v29  ;;  %v1391_v28 = vld [vmem:[%s1539_s3 + $0x60] sm:$0xff]  ;;  %v1398_v29 = vld [vmem:[%s1539_s3 + $0x58] sm:$0xff] }
  0x30   : > { %351 = vmatprep.subr.mxu0 %v1051_v3  ;;  %431 = vmatprep.subr.mxu1 %v1051_v3 }
  0x31   : > { %352 = vmatpush1.msra.mxu0 %v882_v32  ;;  %432 = vmatpush1.msra.mxu1 %v259_v33  ;;  %v1421_v32 = vld [vmem:[%s1539_s3 + $0x40] sm:$0xff]  ;;  %v1428_v33 = vld [vmem:[%s1539_s3 + $0x38] sm:$0xff] }
  0x32   : > { %353 = vmatprep.subr.mxu0 %v1051_v3  ;;  %433 = vmatprep.subr.mxu1 %v1051_v3 }
  0x33   : > { %354 = vmatpush1.msra.mxu0 %v881_v38  ;;  %434 = vmatpush1.msra.mxu1 %v258_v39  ;;  %v1463_v38 = vld [vmem:[%s1539_s3 + $0x10] sm:$0xff]  ;;  %v1470_v39 = vld [vmem:[%s1539_s3 + $0x8] sm:$0xff] }
  0x34   : > { %383 = vmatprep.subr.mxu0 %v1051_v3  ;;  %463 = vmatprep.subr.mxu1 %v1051_v3 }
  0x35   : > { %384 = vmatpush2.msra.mxu0 %v898_v43  ;;  %464 = vmatpush2.msra.mxu1 %v275_v44 }
  0x36   : > { %385 = vmatprep.subr.mxu0 %v1051_v3  ;;  %899 = vmatprep.mubr.msk.f32.mxu0 %vm318_vm1, %v311_v45 }
  0x37   : > { %386 = vmatpush2.msra.mxu0 %v897_v47  ;;  %465 = vmatprep.subr.mxu1 %v1051_v3 }
  0x38   : > { %388 = vmatmul.mubr.f32.vlgmr.msra.gmra.mxu0 %v308_v49  ;;  %466 = vmatpush2.msra.mxu1 %v274_v50 }
  0x39   : > { %901 = vmatprep.mubr.msk.f32.mxu1 %vm318_vm1, %v255_v52  ;;  %522 = vmatprep.subr.mxu0 %v1051_v3 }
  0x3a   : > { %468 = vmatmul.mubr.f32.vlgmr.msra.gmra.mxu1 %v254_v54  ;;  %523 = vmatpush1.msra.mxu0 %v918_v55 }
  0x3b   : > { %524 = vmatprep.subr.mxu0 %v1051_v3  ;;  %900 = vmatprep.mubr.msk.f32.mxu0 %vm318_vm1, %v315_v56 }
  0x3c   : > { %525 = vmatpush1.msra.mxu0 %v917_v59  ;;  %902 = vmatprep.mubr.msk.f32.mxu1 %vm318_vm1, %v1223_v30  ;;  %v1407_v30 = vld [vmem:[%s1539_s3 + $0x50] sm:$0xff] }
  0x3d   : > { %526 = vmatprep.subr.mxu0 %v1051_v3  ;;  %393 = vmatmul.mubr.f32.gmra.mxu0 %v313_v60 }
  0x3e   : > { %527 = vmatpush1.msra.mxu0 %v916_v61  ;;  %473 = vmatmul.mubr.f32.gmra.mxu1 %v1235_v34  ;;  %v1435_v34 = vld [vmem:[%s1539_s3 + $0x30] sm:$0xff] }
  0x3f   : > { %528 = vmatprep.subr.mxu0 %v1051_v3  ;;  %921 = vmatprep.mubr.msk.f32.mxu0 %vm318_vm1, %v511_v62 }
  0x40   : > { %529 = vmatpush1.msra.mxu0 %v915_v63  ;;  %960 = vmatprep.subr.mxu1 %v1051_v3 }
  0x41   : > { %530 = vmatprep.subr.mxu0 %v1051_v3  ;;  %961 = vmatpush3.msra.mxu1 %v1372_v25 }
  0x42   : > { %531 = vmatpush1.msra.mxu0 %v914_v0  ;;  %962 = vmatprep.subr.mxu1 %v1051_v3 }
  0x43   : > { %532 = vmatprep.subr.mxu0 %v1051_v3  ;;  %963 = vmatpush3.msra.mxu1 %v1377_v26 }
  0x44   : > { %533 = vmatpush1.msra.mxu0 %v913_v1  ;;  %964 = vmatprep.subr.mxu1 %v1051_v3 }
  0x45   : > { %534 = vmatprep.subr.mxu0 %v1051_v3  ;;  %965 = vmatpush3.msra.mxu1 %v1384_v27 }
  0x46   : > { %535 = vmatpush1.msra.mxu0 %v912_v2  ;;  %966 = vmatprep.subr.mxu1 %v1051_v3 }
  0x47   : > { %536 = vmatprep.subr.mxu0 %v1051_v3  ;;  %967 = vmatpush3.msra.mxu1 %v1391_v28 }
  0x48   : > { %537 = vmatpush1.msra.mxu0 %v911_v4  ;;  %968 = vmatprep.subr.mxu1 %v1051_v3 }
  0x49   : > { %538 = vmatprep.subr.mxu0 %v1051_v3  ;;  %969 = vmatpush3.msra.mxu1 %v1398_v29 }
  0x4a   : > { %539 = vmatpush1.msra.mxu0 %v910_v5  ;;  %970 = vmatprep.subr.mxu1 %v1051_v3 }
  0x4b   : > { %540 = vmatprep.subr.mxu0 %v1051_v3  ;;  %971 = vmatpush3.msra.mxu1 %v1407_v30 }
  0x4c   : > { %541 = vmatpush1.msra.mxu0 %v909_v6  ;;  %972 = vmatprep.subr.mxu1 %v1051_v3 }
  0x4d   : > { %542 = vmatprep.subr.mxu0 %v1051_v3  ;;  %973 = vmatpush3.msra.mxu1 %v1414_v31 }
  0x4e   : > { %543 = vmatpush1.msra.mxu0 %v908_v7  ;;  %974 = vmatprep.subr.mxu1 %v1051_v3 }
  0x4f   : > { %544 = vmatprep.subr.mxu0 %v1051_v3  ;;  %975 = vmatpush3.msra.mxu1 %v1421_v32 }
  0x50   : > { %545 = vmatpush1.msra.mxu0 %v907_v8  ;;  %976 = vmatprep.subr.mxu1 %v1051_v3 }
  0x51   : > { %546 = vmatprep.subr.mxu0 %v1051_v3  ;;  %977 = vmatpush3.msra.mxu1 %v1428_v33 }
  0x52   : > { %547 = vmatpush1.msra.mxu0 %v906_v9  ;;  %978 = vmatprep.subr.mxu1 %v1051_v3 }
  0x53   : > { %548 = vmatprep.subr.mxu0 %v1051_v3  ;;  %979 = vmatpush3.msra.mxu1 %v1435_v34 }
  0x54   : > { %549 = vmatpush1.msra.mxu0 %v905_v10  ;;  %980 = vmatprep.subr.mxu1 %v1051_v3 }
  0x55   : > { %550 = vmatprep.subr.mxu0 %v1051_v3  ;;  %981 = vmatpush3.msra.mxu1 %v1442_v35 }
  0x56   : > { %551 = vmatpush1.msra.mxu0 %v904_v11  ;;  %982 = vmatprep.subr.mxu1 %v1051_v3 }
  0x57   : > { %552 = vmatprep.subr.mxu0 %v1051_v3  ;;  %983 = vmatpush3.msra.mxu1 %v1449_v36 }
  0x58   : > { %553 = vmatpush1.msra.mxu0 %v903_v14  ;;  %984 = vmatprep.subr.mxu1 %v1051_v3 }
  0x59   : > { %582 = vmatprep.subr.mxu0 %v1051_v3  ;;  %985 = vmatpush3.msra.mxu1 %v1456_v37 }
  0x5a   : > { %583 = vmatpush2.msra.mxu0 %v920_v17  ;;  %986 = vmatprep.subr.mxu1 %v1051_v3  ;;  %v715_v17 = vld [vmem:[%s1542_s6] sm:$0x1] }
  0x5b   : > { %584 = vmatprep.subr.mxu0 %v1051_v3  ;;  %987 = vmatpush3.msra.mxu1 %v1463_v38 }
  0x5c   : > { %585 = vmatpush2.msra.mxu0 %v919_v20  ;;  %988 = vmatprep.subr.mxu1 %v1051_v3 }
  0x5d   : > { %587 = vmatmul.mubr.f32.vlgmr.msra.gmra.mxu0 %v508_v21  ;;  %989 = vmatpush3.msra.mxu1 %v1470_v39 }
  0x5e   : > { %922 = vmatprep.mubr.msk.f32.mxu0 %vm318_vm1, %v515_v23  ;;  %990 = vmatprep.subr.mxu1 %v1051_v3 }
  0x5f   : > { %992 = vmatprep.mubr.msk.f32.mxu1 %vm1052_vm3, %v1051_v3  ;;  %991 = vmatpush3.msra.mxu1 %v1476_v40 }
  0x60   : > { %995 = vmatprep.subr.mxu1 %v1051_v3 }
  0x61   : > { %592 = vmatmul.mubr.f32.gmra.mxu0 %v513_v24 }
  0xf8   : > { %v389_v41 = vpop.f32.mrf.mxu0 }
  0xfa   : > { %v469_v42 = vpop.f32.mrf.mxu1  ;;  %v391_v43 = vpop.f32.mrf.mxu0 }
  0xfb   : > { %v470_v49 = vadd.f32 %v469_v42, %v389_v41 }
  0xfc   : > { %v471_v44 = vpop.f32.mrf.mxu1 }
  0xfd   : > { %v394_v45 = vpop.f32.mrf.mxu0 }
  0xfe   : > { %v474_v46 = vpop.f32.mrf.mxu1 }
  0xff   : > { %v396_v47 = vpop.f32.mrf.mxu0  ;;  %v475_v54 = vadd.f32 %v474_v46, %v394_v45 }
 0x100   : > { %v476_v48 = vpop.f32.mrf.mxu1 }
 0x11d   : > { %v588_v50 = vpop.f32.mrf.mxu0 }
 0x11e   : > { %v597_v52 = vadd.f32 %v588_v50, %v470_v49 }
 0x11f   : > { %v590_v53 = vpop.f32.mrf.mxu0 }
 0x120   : > { %v606_v55 = vadd.f32 %v923_v51, %v597_v52 }
 0x121   : > { %v593_v56 = vpop.f32.mrf.mxu0 }
 0x122   : > { %608 = vst [vmem:[%s1104_s8] sm:$0xff] %v606_v55  ;;  %v598_v57 = vadd.f32 %v593_v56, %v475_v54  ;;  %v617_v5 = vmul.f32 %v606_v55, %v606_v55 }
 0x123   : > { %v595_v58 = vpop.f32.mrf.mxu0 }
 0x124   : > { %v607_v59 = vadd.f32 %v923_v51, %v598_v57 }
 0x126   : > { %609 = vst [vmem:[%s1104_s8 + $0x8] sm:$0xff] %v607_v59  ;;  %v610_v60 = vadd.f32 %v607_v59, %v606_v55  ;;  %v618_v4 = vmul.f32 %v607_v59, %v607_v59 }
 0x128   : > { %v611_v61 = vrot.slane %v610_v60, 4  ;;  %v619_v6 = vadd.f32 %v618_v4, %v617_v5 }
 0x12a   : > { %v612_v62 = vadd.f32 %v611_v61, %v610_v60  ;;  %v620_v7 = vrot.slane %v619_v6, 4 }
 0x12c   : > { %v613_v63 = vrot.slane %v612_v62, 2  ;;  %v621_v8 = vadd.f32 %v620_v7, %v619_v6 }
 0x12e   : > { %v614_v0 = vadd.f32 %v613_v63, %v612_v62  ;;  %v622_v9 = vrot.slane %v621_v8, 2 }
 0x130   : > { %v615_v1 = vrot.slane %v614_v0, 1  ;;  %v623_v10 = vadd.f32 %v622_v9, %v621_v8 }
 0x132   : > { %v616_v2 = vadd.f32 %v615_v1, %v614_v0  ;;  %v624_v11 = vrot.slane %v623_v10, 1 }
 0x134   : > { %993 = vmatmul.mubr.f32.vlgmr.msra.gmra.mxu1 %v616_v2  ;;  %v625_v12 = vadd.f32 %v624_v11, %v623_v10 }
 0x135   : > { %996 = vmatpush3.msra.mxu1 %v1372_v25  ;;  %1027 = vmatprep.mubr.msk.f32.mxu1 %vm1052_vm3, %v1051_v3 }
 0x136   : > { %997 = vmatprep.subr.mxu1 %v1051_v3 }
 0x137   : > { %998 = vmatpush3.msra.mxu1 %v1377_v26 }
 0x138   : > { %999 = vmatprep.subr.mxu1 %v1051_v3 }
 0x139   : > { %1000 = vmatpush3.msra.mxu1 %v1384_v27 }
 0x13a   : > { %1001 = vmatprep.subr.mxu1 %v1051_v3 }
 0x13b   : > { %1002 = vmatpush3.msra.mxu1 %v1391_v28 }
 0x13c   : > { %1003 = vmatprep.subr.mxu1 %v1051_v3 }
 0x13d   : > { %1004 = vmatpush3.msra.mxu1 %v1398_v29 }
 0x13e   : > { %1005 = vmatprep.subr.mxu1 %v1051_v3 }
 0x13f   : > { %1006 = vmatpush3.msra.mxu1 %v1407_v30 }
 0x140   : > { %1007 = vmatprep.subr.mxu1 %v1051_v3 }
 0x141   : > { %1008 = vmatpush3.msra.mxu1 %v1414_v31 }
 0x142   : > { %1009 = vmatprep.subr.mxu1 %v1051_v3 }
 0x143   : > { %1010 = vmatpush3.msra.mxu1 %v1421_v32 }
 0x144   : > { %1011 = vmatprep.subr.mxu1 %v1051_v3 }
 0x145   : > { %1012 = vmatpush3.msra.mxu1 %v1428_v33 }
 0x146   : > { %1013 = vmatprep.subr.mxu1 %v1051_v3 }
 0x147   : > { %1014 = vmatpush3.msra.mxu1 %v1435_v34 }
 0x148   : > { %1015 = vmatprep.subr.mxu1 %v1051_v3 }
 0x149   : > { %1016 = vmatpush3.msra.mxu1 %v1442_v35 }
 0x14a   : > { %1017 = vmatprep.subr.mxu1 %v1051_v3 }
 0x14b   : > { %1018 = vmatpush3.msra.mxu1 %v1449_v36 }
 0x14c   : > { %1019 = vmatprep.subr.mxu1 %v1051_v3 }
 0x14d   : > { %1020 = vmatpush3.msra.mxu1 %v1456_v37 }
 0x14e   : > { %1021 = vmatprep.subr.mxu1 %v1051_v3 }
 0x14f   : > { %1022 = vmatpush3.msra.mxu1 %v1463_v38 }
 0x150   : > { %1023 = vmatprep.subr.mxu1 %v1051_v3 }
 0x151   : > { %1024 = vmatpush3.msra.mxu1 %v1470_v39 }
 0x152   : > { %1025 = vmatprep.subr.mxu1 %v1051_v3 }
 0x153   : > { %1026 = vmatpush3.msra.mxu1 %v1476_v40 }
 0x154   : > { %1028 = vmatmul.mubr.f32.vlgmr.msra.gmra.mxu1 %v625_v12 }
 0x1f4   : > { %v709_v14 = vpop.f32.mrf.mxu1 }
 0x1f5   : > { %v713_v15 = vadd.f32 %v709_v14, %v626_v13 }
 0x1f6   : > { %v994_v16 = vpop.f32.mrf.mxu1 }
 0x1f7   : > { %714 = vst [vmem:[%s1541_s5] sm:$0x1] %v713_v15 }
 0x214   : > { %v798_v3 = vpop.f32.mrf.mxu1 }
 0x215   : > { %v802_v18 = vadd.f32 %v798_v3, %v715_v17 }
 0x216   : > { %v1029_v19 = vpop.f32.mrf.mxu1 }
 0x217   : > { %803 = vst [vmem:[%s1542_s6] sm:$0x1] %v802_v18 }
 0x218 PF: > { %s17_s21 = sadd.s32 1, %s1048_s21  }
 0x219   : > { %p14_p6 = scmp.ge.s32.totalorder %s17_s21, 4  }
 0x21b   :  { %16 = sbr.rel (!%p14_p6) target bundleno = 1 (0x1), region = 88 }

// kernel: encoder_forward.7
= control target key start
LH: loop header
LB: loop body
LE: loop exit
PB: predicated region body
PF: predicated region fallthrough
CT: control target
= control target key end

     0   :  { %s546_s21 = smov 0   ;;  %s593_s0 = inlined_call_operand.vmem [shape: f32[16,2,128], index: 0, kind: input, shape index: {}]   ;;  %s594_s1 = inlined_call_operand.vmem [shape: f32[1,128], index: 1, kind: input, shape index: {}]   ;;  %s595_s2 = inlined_call_operand.vmem [shape: f32[1,128], index: 2, kind: input, shape index: {}]   ;;  %s596_s3 = inlined_call_operand.vmem [shape: f32[1,128], index: 3, kind: input, shape index: {}]   ;;  %s597_s4 = inlined_call_operand.vmem [shape: f32[1,128], index: 4, kind: input, shape index: {}]   ;;  %s598_s5 = inlined_call_operand.vmem [shape: f32[16,2,128], index: 5, kind: output, shape index: {0}]   ;;  %s599_s6 = inlined_call_operand.vmem [shape: f32[16,128], index: 6, kind: output, shape index: {1}]  }
   0x1 LB: > { %s552_s22 = sadd.s32 4294967295, %s509_s21   ;;  %p485_p0 = scmp.ge.s32.totalorder %s509_s21, 1  ;;  %s509_s21 = sphi %s546_s21, %s17_s21  }
   0x2   : > { %p216_p1 = scmp.lt.s32.totalorder %s509_s21, 3 }
   0x4   : > { %p217_p2 = pnand %p485_p0, %p216_p1 }
   0x5   : > { %s486_s27 = sshll.u32 (!%p217_p2), %s552_s22, 3  ;;  %p262_p4 = scmp.lt.s32.totalorder (!%p217_p2), %s552_s22, 1 }
   0x6   : > { %220 = sbr.rel (%p217_p2) target bundleno = 60 (0x3c), region = 40  ;;  %p251_p3 = scmp.lt.s32.totalorder (!%p217_p2), %s486_s27, 15 }
   0xb   : > { %v266_v0 = vld [vmem:[%s594_s1] sm:$0x1]  ;;  %v288_v7 = vlaneseq  ;;  %s601_s27 = smov (!%p251_p3, %s486_s27), 15  ;;  %vm372_vm0 = vcmask 1041409   ;;  %s603_s22 = smov (!%p262_p4, %s552_s22), 1  ;;  %vm375_vm1 = vcmask 1042434  }
   0xc   : > { %v267_v1 = vld [vmem:[%s595_s2] sm:$0x1]  ;;  %v270_v2 = vmul.f32 0.001953125, %v266_v0  ;;  %s487_s28 = sshll.u32 %s601_s27, 1  ;;  %vm378_vm2 = vcmask 1043459   ;;  %vm381_vm3 = vcmask 1044484  }
   0xd   : > { %v271_v3 = vmul.f32 0.001953125, %v267_v1  ;;  %v289_v8 = vshrl.u32 %v288_v7, 7  ;;  %v268_v9 = vld [vmem:[%s596_s3] sm:$0x1]  ;;  %s254_s9 = scalar_lea.vmem %s593_s0, %s487_s28  ;;  %s260_s14 = scalar_lea.vmem %s598_s5, %s487_s28  ;;  %vm384_vm4 = vcmask 1045509   ;;  %vm387_vm5 = vcmask 1046534  }
   0xe   : > { %v272_v4 = vmul.f32 %v270_v2, %v270_v2  ;;  %v269_v12 = vld [vmem:[%s597_s4] sm:$0x1]  ;;  %v280_v15 = vld [vmem:[%s254_s9 + $0x2] sm:$0x3]  ;;  %v281_v16 = vld [vmem:[%s254_s9 + $0x4] sm:$0x3] }
   0xf   : > { %v290_v10 = vsub.s32 0, %v289_v8  ;;  %v279_v14 = vld [vmem:[%s254_s9] sm:$0x3]  ;;  %v282_v17 = vld [vmem:[%s254_s9 + $0x6] sm:$0x3]  ;;  %s490_s15 = sshll.u32 %s603_s22, 3 }
  0x10   : > { %v273_v5 = vsub.f32 %v271_v3, %v272_v4  ;;  %v283_v20 = vld [vmem:[%s254_s9 + $0x8] sm:$0x3]  ;;  %v284_v21 = vld [vmem:[%s254_s9 + $0xa] sm:$0x3]  ;;  %v285_v22 = vld [vmem:[%s254_s9 + $0xc] sm:$0x3]  ;;  %s265_s18 = scalar_lea.vmem %s599_s6, %s490_s15 }
  0x11   : > { %v286_v23 = vld [vmem:[%s254_s9 + $0xe] sm:$0x3]  ;;  %vm390_vm6 = vcmask 1047559  }
  0x12   : > { %v274_v6 = vadd.f32 1e-05, %v273_v5 }
  0x14   : > { %501 = vrsqrt.f32 %v274_v6 }
  0x21   : > { %v502_v11 = vpop.eup %501 }
  0x22   : > { %v276_v13 = vmul.f32 %v502_v11, %v268_v9 }
  0x24   : > { %v277_v18 = vmul.f32 %v276_v13, %v270_v2  ;;  %v291_v19 = vrot.slane %v276_v13, %v290_v10 }
  0x26   : > { %v278_v24 = vsub.f32 %v269_v12, %v277_v18  ;;  %v293_v25 = vmul.f32 %v291_v19, %v279_v14  ;;  %v294_v26 = vmul.f32 %v291_v19, %v280_v15  ;;  %v295_v27 = vmul.f32 %v291_v19, %v281_v16 }
  0x27   : > { %v296_v28 = vmul.f32 %v291_v19, %v282_v17  ;;  %v297_v29 = vmul.f32 %v291_v19, %v283_v20  ;;  %v298_v30 = vmul.f32 %v291_v19, %v284_v21  ;;  %v299_v31 = vmul.f32 %v291_v19, %v285_v22 }
  0x28   : > { %v305_v32 = vrot.slane %v278_v24, %v290_v10  ;;  %v300_v33 = vmul.f32 %v291_v19, %v286_v23 }
  0x2a   : > { %v307_v34 = vadd.f32 %v305_v32, %v293_v25  ;;  %v308_v35 = vadd.f32 %v305_v32, %v294_v26  ;;  %v309_v36 = vadd.f32 %v305_v32, %v295_v27  ;;  %v310_v37 = vadd.f32 %v305_v32, %v296_v28 }
  0x2b   : > { %v311_v38 = vadd.f32 %v305_v32, %v297_v29  ;;  %v312_v39 = vadd.f32 %v305_v32, %v298_v30  ;;  %v313_v40 = vadd.f32 %v305_v32, %v299_v31  ;;  %v314_v41 = vadd.f32 %v305_v32, %v300_v33 }
  0x2c   : > { %v315_v42 = vmax.f32 %v307_v34, 0.0  ;;  %v316_v43 = vmax.f32 %v308_v35, 0.0  ;;  %v317_v44 = vmax.f32 %v309_v36, 0.0  ;;  %v318_v45 = vmax.f32 %v310_v37, 0.0 }
  0x2d   : > { %v319_v46 = vmax.f32 %v311_v38, 0.0  ;;  %v320_v47 = vmax.f32 %v312_v39, 0.0  ;;  %v321_v48 = vmax.f32 %v313_v40, 0.0  ;;  %v322_v49 = vmax.f32 %v314_v41, 0.0 }
  0x2e   : > { %323 = vst [vmem:[%s260_s14] sm:$0x3] %v315_v42  ;;  %v339_v50 = vrot.slane %v315_v42, 1  ;;  %324 = vst [vmem:[%s260_s14 + $0x2] sm:$0x3] %v316_v43  ;;  %v340_v51 = vrot.slane %v316_v43, 1  ;;  %v341_v52 = vrot.slane %v317_v44, 1 }
  0x2f   : > { %325 = vst [vmem:[%s260_s14 + $0x4] sm:$0x3] %v317_v44  ;;  %326 = vst [vmem:[%s260_s14 + $0x6] sm:$0x3] %v318_v45  ;;  %v342_v53 = vrot.slane %v318_v45, 1  ;;  %v343_v54 = vrot.slane %v319_v46, 1 }
  0x30   : > { %327 = vst [vmem:[%s260_s14 + $0x8] sm:$0x3] %v319_v46  ;;  %328 = vst [vmem:[%s260_s14 + $0xa] sm:$0x3] %v320_v47  ;;  %v344_v55 = vrot.slane %v320_v47, 1  ;;  %v345_v56 = vrot.slane %v321_v48, 1  ;;  %v355_v58 = vmax.f32 %v315_v42, %v339_v50  ;;  %v356_v59 = vmax.f32 %v316_v43, %v340_v51 }
  0x31   : > { %329 = vst [vmem:[%s260_s14 + $0xc] sm:$0x3] %v321_v48  ;;  %330 = vst [vmem:[%s260_s14 + $0xe] sm:$0x3] %v322_v49  ;;  %v346_v57 = vrot.slane %v322_v49, 1  ;;  %v357_v60 = vmax.f32 %v317_v44, %v341_v52  ;;  %v358_v61 = vmax.f32 %v318_v45, %v342_v53  ;;  %v359_v62 = vmax.f32 %v319_v46, %v343_v54 }
  0x32   : > { %v360_v63 = vmax.f32 %v320_v47, %v344_v55  ;;  %v361_v0 = vmax.f32 %v321_v48, %v345_v56  ;;  %v371_v1 = vrot.slane %v356_v59, 7 }
  0x33   : > { %v374_v2 = vrot.slane %v357_v60, 6  ;;  %v377_v3 = vrot.slane %v358_v61, 5  ;;  %v362_v4 = vmax.f32 %v322_v49, %v346_v57  ;;  %v380_v5 = vrot.slane %v359_v62, 4 }
  0x34   : > { %v373_v6 = vsel %vm372_vm0, %v371_v1, %v355_v58  ;;  %v383_v7 = vrot.slane %v360_v63, 3  ;;  %v386_v9 = vrot.slane %v361_v0, 2 }
  0x35   : > { %v376_v8 = vsel %vm375_vm1, %v374_v2, %v373_v6  ;;  %v389_v11 = vrot.slane %v362_v4, 1 }
  0x36   : > { %v379_v10 = vsel %vm378_vm2, %v377_v3, %v376_v8 }
  0x37   : > { %v382_v12 = vsel %vm381_vm3, %v380_v5, %v379_v10 }
  0x38   : > { %v385_v13 = vsel %vm384_vm4, %v383_v7, %v382_v12 }
  0x39   : > { %v388_v14 = vsel %vm387_vm5, %v386_v9, %v385_v13 }
  0x3a   : > { %v391_v15 = vsel %vm390_vm6, %v389_v11, %v388_v14 }
  0x3b   : > { %393 = vst [vmem:[%s265_s18] sm:$0xff] %v391_v15 }
  0x3c PF: > { %s17_s21 = sadd.s32 1, %s509_s21  }
  0x3d   : > { %p14_p5 = scmp.ge.s32.totalorder %s17_s21, 4  }
  0x3f   :  { %16 = sbr.rel (!%p14_p5) target bundleno = 1 (0x1), region = 82 }

</bundles_post_ra>
